<compile_context>
chip_gen: v5e
topology: v5e:2x2
jax: 0.10.0
libtpu: 0.0.40
codegen_flags: <defaults>
</compile_context>

<pallas_src>
import functools

import jax
import jax.numpy as jnp
from jax import lax
from jax.experimental import pallas as pl
from jax.experimental.pallas import tpu as pltpu

KH = KW = 7
STRIDE = 2
PAD = 3
POOL_K, POOL_S, POOL_P = 3, 2, 1
EPS = 1e-5
LANES = 128


def _round_up(x, m):
    return (x + m - 1) // m * m


def _vmem_limit_bytes():
    # ~3/4 of physical VMEM: ~96 MiB on v5e/v6e (128 MiB phys), ~48 MiB on v7x.
    try:
        cap = pltpu.get_tpu_info().vmem_capacity_bytes
    except Exception:
        cap = 64 * 1024 * 1024
    return int(min((cap * 3) // 4, 100 * 1024 * 1024))


VMEM_LIMIT = _vmem_limit_bytes()


def _pick_tile_oh(oh, ow, target_rows=2048, max_rows=8192):
    """Largest divisor of oh whose tile has <= target_rows patch rows."""
    best = 1
    for d in range(1, oh + 1):
        if oh % d == 0 and d * ow <= target_rows:
            best = d
    if best * ow < 256:
        # Degenerate divisor structure (e.g. prime oh): prefer one big tile if
        # it still fits comfortably, instead of oh tiny grid steps.
        for d in range(oh, 0, -1):
            if oh % d == 0 and d * ow <= max_rows:
                return d
    return best


# ---------------------------------------------------------------------------
# Pass 1: conv (one bf16 MXU matmul per row tile) + per-tile BN partial stats.
# ---------------------------------------------------------------------------
def _conv_stats_kernel(x_ref, w_ref, b_ref, y_ref, stat_ref, *,
                       tile_oh, ow, c4, cpad):
    t = pl.program_id(1)
    row0 = t * tile_oh

    # In-VMEM im2col of the parity-split input: 16 shifted (a, b) slabs,
    # concatenated along lanes -> (tile_oh*ow, 16*c4) bf16 patch matrix.
    slabs = []
    for a in range(4):
        xa = x_ref[0, pl.ds(row0 + a, tile_oh), :, :]      # (tile_oh, WP2, c4)
        for b in range(4):
            slabs.append(lax.slice_in_dim(xa, b, b + ow, axis=1))
    patches = jnp.concatenate(slabs, axis=-1)              # (tile_oh, ow, 16*c4)
    patches = patches.reshape(tile_oh * ow, 16 * c4)

    # bf16 x bf16 on the MXU, f32 accumulation.
    acc = jnp.dot(patches, w_ref[...], preferred_element_type=jnp.float32)
    y = acc + b_ref[...]                                    # conv bias, f32
    y_ref[...] = y.astype(y_ref.dtype).reshape(1, tile_oh, ow, cpad)

    # Numerically-stable per-tile partials from the f32 accumulator:
    # [sum, sum of squared deviations about the tile mean]; merged globally
    # (Chan's formula) in the wrapper.
    rows = tile_oh * ow
    s = jnp.sum(y, axis=0, keepdims=True)                   # (1, cpad)
    mu = s * (1.0 / rows)
    d = y - mu
    m2 = jnp.sum(d * d, axis=0, keepdims=True)              # (1, cpad)
    stat_ref[...] = jnp.concatenate([s, m2], axis=0).reshape(1, 1, 2, cpad)


# ---------------------------------------------------------------------------
# Pass 2: BatchNorm (folded scale/shift) + ReLU + vectorized 3x3/s2 max pool.
# ---------------------------------------------------------------------------
def _bn_relu_pool_kernel(y_ref, scale_ref, shift_ref, pool_ref, pad_ref, m1_ref,
                         *, oh, ow, ph, pw, cpad):
    y = y_ref[0].astype(jnp.float32)                        # (oh, ow, cpad)
    r = jnp.maximum(y * scale_ref[0] + shift_ref[0], 0.0)   # BN + ReLU

    hpad = 2 * ph + 2
    wpad = 2 * pw + 2
    pad_b = hpad - (oh + 1)          # >= 1
    pad_r = wpad - (ow + 1)          # >= 1

    # Zero padding == -inf padding here because every pooling window contains
    # at least one valid post-ReLU (>= 0) element.  Re-zero only the 1-element
    # border (tiny writes) and slice-write r into the interior: no
    # concat-based relayout/copy of the whole image.
    pad_ref[pl.ds(0, 1), :, :] = jnp.zeros((1, wpad, cpad), jnp.float32)
    pad_ref[pl.ds(oh + 1, pad_b), :, :] = jnp.zeros((pad_b, wpad, cpad),
                                                    jnp.float32)
    pad_ref[:, pl.ds(0, 1), :] = jnp.zeros((hpad, 1, cpad), jnp.float32)
    pad_ref[:, pl.ds(ow + 1, pad_r), :] = jnp.zeros((hpad, pad_r, cpad),
                                                    jnp.float32)
    pad_ref[pl.ds(1, oh), pl.ds(1, ow), :] = r

    # Separable pool, H direction: padded rows {2i, 2i+1, 2i+2}.  The stride-2
    # pick is a leading-dim reshape (no sublane/lane relayout).
    ev = pad_ref[pl.ds(0, 2 * ph), :, :].reshape(ph, 2, wpad, cpad)
    od = pad_ref[pl.ds(2, 2 * ph), :, :].reshape(ph, 2, wpad, cpad)
    m1_ref[...] = jnp.maximum(jnp.maximum(ev[:, 0], ev[:, 1]), od[:, 0])

    # W direction: padded cols {2j, 2j+1, 2j+2} via strided reads from scratch.
    c0 = m1_ref[:, pl.ds(0, pw, 2), :]
    c1 = m1_ref[:, pl.ds(1, pw, 2), :]
    c2 = m1_ref[:, pl.ds(2, pw, 2), :]
    pool_ref[0] = jnp.maximum(jnp.maximum(c0, c1), c2)


def swift_lane_base_res_block_alter(x_nchw, w_oihw, bias, gamma, beta):
    n, cin, h, w_in = x_nchw.shape
    cout = w_oihw.shape[0]
    oh = (h + 2 * PAD - KH) // STRIDE + 1
    ow = (w_in + 2 * PAD - KW) // STRIDE + 1
    ph = (oh + 2 * POOL_P - POOL_K) // POOL_S + 1
    pw = (ow + 2 * POOL_P - POOL_K) // POOL_S + 1
    cpad = _round_up(cout, LANES)       # lane-dense outputs (Cout -> 128)
    c4 = 4 * cin                        # parity-split channels
    k = 16 * c4                         # matmul contraction (a,b,p,q,c)
    hp2, wp2 = oh + 3, ow + 3           # parity-grid spatial extents
    tile_oh = _pick_tile_oh(oh, ow)
    t_tiles = oh // tile_oh

    # ---- space-to-depth parity split (pure relayout, ~input-sized, in XLA) --
    # Turns the stride-2 7x7 conv into a stride-1 4x4 conv over 4*Cin channels,
    # so no 12x-expanded im2col tensor ever touches HBM.  Cast to bf16 once.
    x_nhwc = jnp.transpose(x_nchw, (0, 2, 3, 1))
    xp = jnp.pad(x_nhwc, ((0, 0), (PAD, PAD), (PAD, PAD), (0, 0)))
    hp, wp = h + 2 * PAD, w_in + 2 * PAD
    xp = jnp.pad(xp, ((0, 0), (0, 2 * hp2 - hp), (0, 2 * wp2 - wp), (0, 0)))
    x_s2d = xp.reshape(n, hp2, 2, wp2, 2, cin)
    x_s2d = jnp.transpose(x_s2d, (0, 1, 3, 2, 4, 5)).reshape(n, hp2, wp2, c4)
    x_s2d = x_s2d.astype(jnp.bfloat16)

    # ---- weights: 7x7/s2 conv == 4x4/s1 conv over parity-split channels -----
    w_ext = jnp.zeros((cout, cin, 8, 8), w_oihw.dtype)
    w_ext = w_ext.at[:, :, :KH, :KW].set(w_oihw)
    w_r = w_ext.reshape(cout, cin, 4, 2, 4, 2)          # [co, c, a, p, b, q]
    w_r = jnp.transpose(w_r, (2, 4, 3, 5, 1, 0))        # [a, b, p, q, c, co]
    w_mat = w_r.reshape(k, cout)
    w_mat = jnp.pad(w_mat, ((0, 0), (0, cpad - cout))).astype(jnp.bfloat16)
    b_pad = jnp.pad(bias, (0, cpad - cout)).astype(jnp.float32).reshape(1, cpad)

    # ---------------- pass 1: conv + BN partial stats ------------------------
    kernel1 = functools.partial(_conv_stats_kernel, tile_oh=tile_oh, ow=ow,
                                c4=c4, cpad=cpad)
    y_full, stats = pl.pallas_call(
        kernel1,
        grid=(n, t_tiles),
        in_specs=[
            # full parity-split image stays resident across its row tiles
            pl.BlockSpec((1, hp2, wp2, c4), lambda i, t: (i, 0, 0, 0)),
            pl.BlockSpec((k, cpad), lambda i, t: (0, 0)),
            pl.BlockSpec((1, cpad), lambda i, t: (0, 0)),
        ],
        out_specs=(
            pl.BlockSpec((1, tile_oh, ow, cpad), lambda i, t: (i, t, 0, 0)),
            pl.BlockSpec((1, 1, 2, cpad), lambda i, t: (i, t, 0, 0)),
        ),
        out_shape=(
            jax.ShapeDtypeStruct((n, oh, ow, cpad), jnp.bfloat16),
            jax.ShapeDtypeStruct((n, t_tiles, 2, cpad), jnp.float32),
        ),
        compiler_params=pltpu.CompilerParams(
            dimension_semantics=("parallel", "parallel"),
            vmem_limit_bytes=VMEM_LIMIT),
    )(x_s2d, w_mat, b_pad)

    # ---- global BatchNorm batch statistics (biased var) via Chan's merge ----
    rows_t = float(tile_oh * ow)
    count = float(n * oh * ow)
    tile_sum = stats[:, :, 0, :]                         # (n, t_tiles, cpad)
    tile_m2 = stats[:, :, 1, :]
    tile_mean = tile_sum / rows_t
    mean = jnp.sum(tile_sum, axis=(0, 1)) / count
    var = (jnp.sum(tile_m2, axis=(0, 1))
           + rows_t * jnp.sum((tile_mean - mean) ** 2, axis=(0, 1))) / count
    var = jnp.maximum(var, 0.0)
    gamma_pad = jnp.pad(gamma.astype(jnp.float32), (0, cpad - cout))
    beta_pad = jnp.pad(beta.astype(jnp.float32), (0, cpad - cout))
    inv = lax.rsqrt(var + EPS)
    scale = (gamma_pad * inv).reshape(1, cpad)
    shift = (beta_pad - mean * gamma_pad * inv).reshape(1, cpad)

    # ---------------- pass 2: BN + ReLU + 3x3/s2 max pool --------------------
    kernel2 = functools.partial(_bn_relu_pool_kernel, oh=oh, ow=ow, ph=ph,
                                pw=pw, cpad=cpad)
    pooled = pl.pallas_call(
        kernel2,
        grid=(n,),
        in_specs=[
            pl.BlockSpec((1, oh, ow, cpad), lambda i: (i, 0, 0, 0)),
            pl.BlockSpec((1, cpad), lambda i: (0, 0)),
            pl.BlockSpec((1, cpad), lambda i: (0, 0)),
        ],
        out_specs=pl.BlockSpec((1, ph, pw, cpad), lambda i: (i, 0, 0, 0)),
        out_shape=jax.ShapeDtypeStruct((n, ph, pw, cpad), jnp.float32),
        scratch_shapes=[
            pltpu.VMEM((2 * ph + 2, 2 * pw + 2, cpad), jnp.float32),
            pltpu.VMEM((ph, 2 * pw + 2, cpad), jnp.float32),
        ],
        compiler_params=pltpu.CompilerParams(
            dimension_semantics=("parallel",),
            vmem_limit_bytes=VMEM_LIMIT),
    )(y_full, scale, shift)

    # NCHW views for the PyTorch interface (layout plumbing left to XLA).
    # y is stored bf16 in HBM (bandwidth); cast back to f32 at the interface.
    y_nchw = jnp.transpose(y_full[:, :, :, :cout], (0, 3, 1, 2)).astype(jnp.float32)
    pool_nchw = jnp.transpose(pooled[:, :, :, :cout], (0, 3, 1, 2))
    return pool_nchw, y_nchw


def _reference(x, w, b, gamma, beta):
    """Pure-JAX reference for correctness checking."""
    y = lax.conv_general_dilated(
        x, w, (STRIDE, STRIDE), [(PAD, PAD), (PAD, PAD)],
        dimension_numbers=('NCHW', 'OIHW', 'NCHW')) + b.reshape(1, -1, 1, 1)
    mean = jnp.mean(y, axis=(0, 2, 3), keepdims=True)
    var = jnp.mean((y - mean) ** 2, axis=(0, 2, 3), keepdims=True)
    bn = (y - mean) / jnp.sqrt(var + EPS) * gamma.reshape(1, -1, 1, 1) \
         + beta.reshape(1, -1, 1, 1)
    r = jnp.maximum(bn, 0.0)
    pooled = lax.reduce_window(
        r, -jnp.inf, lax.max, (1, 1, POOL_K, POOL_K), (1, 1, POOL_S, POOL_S),
        [(0, 0), (0, 0), (POOL_P, POOL_P), (POOL_P, POOL_P)])
    return pooled, y


if __name__ == "__main__":
    key = jax.random.PRNGKey(0)
    kx, kw, kb, kg, kbe = jax.random.split(key, 5)

    channels, out_channels = 4, 64
    x = jax.random.normal(kx, (2, channels, 16, 16), jnp.float32)
    w = jax.random.normal(kw, (out_channels, channels, KH, KW), jnp.float32) * 0.05
    b = jax.random.normal(kb, (out_channels,), jnp.float32) * 0.1
    gamma = 1.0 + 0.1 * jax.random.normal(kg, (out_channels,), jnp.float32)
    beta = 0.1 * jax.random.normal(kbe, (out_channels,), jnp.float32)

    fwd = jax.jit(swift_lane_base_res_block_alter)
    pooled, y = fwd(x, w, b, gamma, beta)
    jax.block_until_ready((pooled, y))

    assert pooled.shape == (2, out_channels, 4, 4), pooled.shape
    assert y.shape == (2, out_channels, 8, 8), y.shape

    pooled_ref, y_ref = _reference(x, w, b, gamma, beta)
    # bf16 MXU matmul + bf16 y storage => ~1e-2 relative deviation budget.
    assert jnp.allclose(y, y_ref, rtol=3e-2, atol=3e-2), \
        float(jnp.max(jnp.abs(y - y_ref)))
    assert jnp.allclose(pooled, pooled_ref, rtol=3e-2, atol=3e-2), \
        float(jnp.max(jnp.abs(pooled - pooled_ref)))

    print("KERNEL_OK")
</pallas_src>

<mosaic_0001>
module attributes {stable_mosaic.version = 11 : i64} {
  func.func @_conv_stats_kernel(%arg0: i32, %arg1: i32, %arg2: memref<1x11x11x16xbf16, #tpu.memory_space<vmem>>, %arg3: memref<256x128xbf16, #tpu.memory_space<vmem>>, %arg4: memref<1x128xf32, #tpu.memory_space<vmem>>, %arg5: memref<1x8x8x128xbf16, #tpu.memory_space<vmem>>, %arg6: memref<1x1x2x128xf32, #tpu.memory_space<vmem>>) attributes {dimension_semantics = [#tpu.dimension_semantics<parallel>, #tpu.dimension_semantics<parallel>], iteration_bounds = array<i64: 2, 1>, scalar_prefetch = 0 : i64, scratch_operands = 0 : i64, tpu.core_type = #tpu.core_type<tc>, window_params = [{transform_indices = @transform_0, window_bounds = array<i64: 1, 11, 11, 16>}, {pipeline_mode = #tpu.pipeline_mode<synchronous>, transform_indices = @transform_1, window_bounds = array<i64: 256, 128>}, {pipeline_mode = #tpu.pipeline_mode<synchronous>, transform_indices = @transform_2, window_bounds = array<i64: 1, 128>}, {transform_indices = @transform_3, window_bounds = array<i64: 1, 8, 8, 128>}, {transform_indices = @transform_4, window_bounds = array<i64: 1, 1, 2, 128>}]} {
    %c8_i32 = arith.constant 8 : i32
    %0 = arith.muli %arg1, %c8_i32 : i32
    %c0_i32 = arith.constant 0 : i32
    %1 = arith.addi %0, %c0_i32 : i32
    %c0 = arith.constant 0 : index
    %2 = arith.index_cast %1 : i32 to index
    %c0_0 = arith.constant 0 : index
    %c0_1 = arith.constant 0 : index
    %3 = vector.load %arg2[%c0, %2, %c0_0, %c0_1] : memref<1x11x11x16xbf16, #tpu.memory_space<vmem>>, vector<1x8x11x16xbf16>
    %4 = vector.shape_cast %3 : vector<1x8x11x16xbf16> to vector<8x11x16xbf16>
    %5 = vector.extract_strided_slice %4 {offsets = [0, 0, 0], sizes = [8, 8, 16], strides = [1, 1, 1]} : vector<8x11x16xbf16> to vector<8x8x16xbf16>
    %6 = vector.extract_strided_slice %4 {offsets = [0, 1, 0], sizes = [8, 8, 16], strides = [1, 1, 1]} : vector<8x11x16xbf16> to vector<8x8x16xbf16>
    %7 = vector.extract_strided_slice %4 {offsets = [0, 2, 0], sizes = [8, 8, 16], strides = [1, 1, 1]} : vector<8x11x16xbf16> to vector<8x8x16xbf16>
    %8 = vector.extract_strided_slice %4 {offsets = [0, 3, 0], sizes = [8, 8, 16], strides = [1, 1, 1]} : vector<8x11x16xbf16> to vector<8x8x16xbf16>
    %c1_i32 = arith.constant 1 : i32
    %9 = arith.addi %0, %c1_i32 : i32
    %c0_2 = arith.constant 0 : index
    %10 = arith.index_cast %9 : i32 to index
    %c0_3 = arith.constant 0 : index
    %c0_4 = arith.constant 0 : index
    %11 = vector.load %arg2[%c0_2, %10, %c0_3, %c0_4] : memref<1x11x11x16xbf16, #tpu.memory_space<vmem>>, vector<1x8x11x16xbf16>
    %12 = vector.shape_cast %11 : vector<1x8x11x16xbf16> to vector<8x11x16xbf16>
    %13 = vector.extract_strided_slice %12 {offsets = [0, 0, 0], sizes = [8, 8, 16], strides = [1, 1, 1]} : vector<8x11x16xbf16> to vector<8x8x16xbf16>
    %14 = vector.extract_strided_slice %12 {offsets = [0, 1, 0], sizes = [8, 8, 16], strides = [1, 1, 1]} : vector<8x11x16xbf16> to vector<8x8x16xbf16>
    %15 = vector.extract_strided_slice %12 {offsets = [0, 2, 0], sizes = [8, 8, 16], strides = [1, 1, 1]} : vector<8x11x16xbf16> to vector<8x8x16xbf16>
    %16 = vector.extract_strided_slice %12 {offsets = [0, 3, 0], sizes = [8, 8, 16], strides = [1, 1, 1]} : vector<8x11x16xbf16> to vector<8x8x16xbf16>
    %c2_i32 = arith.constant 2 : i32
    %17 = arith.addi %0, %c2_i32 : i32
    %c0_5 = arith.constant 0 : index
    %18 = arith.index_cast %17 : i32 to index
    %c0_6 = arith.constant 0 : index
    %c0_7 = arith.constant 0 : index
    %19 = vector.load %arg2[%c0_5, %18, %c0_6, %c0_7] : memref<1x11x11x16xbf16, #tpu.memory_space<vmem>>, vector<1x8x11x16xbf16>
    %20 = vector.shape_cast %19 : vector<1x8x11x16xbf16> to vector<8x11x16xbf16>
    %21 = vector.extract_strided_slice %20 {offsets = [0, 0, 0], sizes = [8, 8, 16], strides = [1, 1, 1]} : vector<8x11x16xbf16> to vector<8x8x16xbf16>
    %22 = vector.extract_strided_slice %20 {offsets = [0, 1, 0], sizes = [8, 8, 16], strides = [1, 1, 1]} : vector<8x11x16xbf16> to vector<8x8x16xbf16>
    %23 = vector.extract_strided_slice %20 {offsets = [0, 2, 0], sizes = [8, 8, 16], strides = [1, 1, 1]} : vector<8x11x16xbf16> to vector<8x8x16xbf16>
    %24 = vector.extract_strided_slice %20 {offsets = [0, 3, 0], sizes = [8, 8, 16], strides = [1, 1, 1]} : vector<8x11x16xbf16> to vector<8x8x16xbf16>
    %c3_i32 = arith.constant 3 : i32
    %25 = arith.addi %0, %c3_i32 : i32
    %c0_8 = arith.constant 0 : index
    %26 = arith.index_cast %25 : i32 to index
    %c0_9 = arith.constant 0 : index
    %c0_10 = arith.constant 0 : index
    %27 = vector.load %arg2[%c0_8, %26, %c0_9, %c0_10] : memref<1x11x11x16xbf16, #tpu.memory_space<vmem>>, vector<1x8x11x16xbf16>
    %28 = vector.shape_cast %27 : vector<1x8x11x16xbf16> to vector<8x11x16xbf16>
    %29 = vector.extract_strided_slice %28 {offsets = [0, 0, 0], sizes = [8, 8, 16], strides = [1, 1, 1]} : vector<8x11x16xbf16> to vector<8x8x16xbf16>
    %30 = vector.extract_strided_slice %28 {offsets = [0, 1, 0], sizes = [8, 8, 16], strides = [1, 1, 1]} : vector<8x11x16xbf16> to vector<8x8x16xbf16>
    %31 = vector.extract_strided_slice %28 {offsets = [0, 2, 0], sizes = [8, 8, 16], strides = [1, 1, 1]} : vector<8x11x16xbf16> to vector<8x8x16xbf16>
    %32 = vector.extract_strided_slice %28 {offsets = [0, 3, 0], sizes = [8, 8, 16], strides = [1, 1, 1]} : vector<8x11x16xbf16> to vector<8x8x16xbf16>
    %33 = tpu.concatenate %5, %6, %7, %8, %13, %14, %15, %16, %21, %22, %23, %24, %29, %30, %31, %32 in 2 : vector<8x8x16xbf16>, vector<8x8x16xbf16>, vector<8x8x16xbf16>, vector<8x8x16xbf16>, vector<8x8x16xbf16>, vector<8x8x16xbf16>, vector<8x8x16xbf16>, vector<8x8x16xbf16>, vector<8x8x16xbf16>, vector<8x8x16xbf16>, vector<8x8x16xbf16>, vector<8x8x16xbf16>, vector<8x8x16xbf16>, vector<8x8x16xbf16>, vector<8x8x16xbf16>, vector<8x8x16xbf16> -> vector<8x8x256xbf16>
    %34 = vector.shape_cast %33 : vector<8x8x256xbf16> to vector<64x256xbf16>
    %c0_11 = arith.constant 0 : index
    %c0_12 = arith.constant 0 : index
    %35 = vector.load %arg3[%c0_11, %c0_12] : memref<256x128xbf16, #tpu.memory_space<vmem>>, vector<256x128xbf16>
    %cst = arith.constant dense<0.000000e+00> : vector<64x128xf32>
    %36 = tpu.matmul %34, %35, %cst {dimension_numbers = #tpu.dot_dimension_numbers<[1], [0], [0], [1], [0, 0, 1, 1], [], []>} : vector<64x256xbf16>, vector<256x128xbf16>, vector<64x128xf32> -> vector<64x128xf32>
    %c0_13 = arith.constant 0 : index
    %c0_14 = arith.constant 0 : index
    %37 = vector.load %arg4[%c0_13, %c0_14] : memref<1x128xf32, #tpu.memory_space<vmem>>, vector<1x128xf32>
    %38 = vector.broadcast %37 : vector<1x128xf32> to vector<64x128xf32>
    %39 = arith.addf %36, %38 : vector<64x128xf32>
    %40 = arith.truncf %39 : vector<64x128xf32> to vector<64x128xbf16>
    %41 = vector.shape_cast %40 : vector<64x128xbf16> to vector<1x8x8x128xbf16>
    %c0_15 = arith.constant 0 : index
    %c0_16 = arith.constant 0 : index
    %c0_17 = arith.constant 0 : index
    %c0_18 = arith.constant 0 : index
    %42 = vector.load %arg5[%c0_15, %c0_16, %c0_17, %c0_18] : memref<1x8x8x128xbf16, #tpu.memory_space<vmem>>, vector<1x8x8x128xbf16>
    tpu.vector_store %arg5[%c0_15, %c0_16, %c0_17, %c0_18], %41 {strides = array<i32>} : memref<1x8x8x128xbf16, #tpu.memory_space<vmem>>, vector<1x8x8x128xbf16>,
    %cst_19 = arith.constant dense<0.000000e+00> : vector<128xf32>
    %43 = vector.multi_reduction <add>, %39, %cst_19 [0] : vector<64x128xf32> to vector<128xf32>
    %44 = vector.shape_cast %43 : vector<128xf32> to vector<1x128xf32>
    %cst_20 = arith.constant 1.562500e-02 : f32
    %45 = vector.broadcast %cst_20 : f32 to vector<1x128xf32>
    %46 = arith.mulf %44, %45 : vector<1x128xf32>
    %47 = vector.broadcast %46 : vector<1x128xf32> to vector<64x128xf32>
    %48 = arith.subf %39, %47 : vector<64x128xf32>
    %49 = arith.mulf %48, %48 : vector<64x128xf32>
    %cst_21 = arith.constant dense<0.000000e+00> : vector<128xf32>
    %50 = vector.multi_reduction <add>, %49, %cst_21 [0] : vector<64x128xf32> to vector<128xf32>
    %51 = vector.shape_cast %50 : vector<128xf32> to vector<1x128xf32>
    %52 = tpu.concatenate %44, %51 in 0 : vector<1x128xf32>, vector<1x128xf32> -> vector<2x128xf32>
    %53 = vector.shape_cast %52 : vector<2x128xf32> to vector<1x1x2x128xf32>
    %c0_22 = arith.constant 0 : index
    %c0_23 = arith.constant 0 : index
    %c0_24 = arith.constant 0 : index
    %c0_25 = arith.constant 0 : index
    %54 = vector.load %arg6[%c0_22, %c0_23, %c0_24, %c0_25] : memref<1x1x2x128xf32, #tpu.memory_space<vmem>>, vector<1x1x2x128xf32>
    tpu.vector_store %arg6[%c0_22, %c0_23, %c0_24, %c0_25], %53 {strides = array<i32>} : memref<1x1x2x128xf32, #tpu.memory_space<vmem>>, vector<1x1x2x128xf32>,
    return
  }
  func.func @transform_0(%arg0: i32, %arg1: i32) -> (i32, i32, i32, i32) {
    %c0_i32 = arith.constant 0 : i32
    %c0_i32_0 = arith.constant 0 : i32
    %c0_i32_1 = arith.constant 0 : i32
    %c0_i32_2 = arith.constant 0 : i32
    return %arg0, %c0_i32, %c0_i32_0, %c0_i32_1 : i32, i32, i32, i32
  }
  func.func @transform_1(%arg0: i32, %arg1: i32) -> (i32, i32) {
    %c0_i32 = arith.constant 0 : i32
    %c0_i32_0 = arith.constant 0 : i32
    %c0_i32_1 = arith.constant 0 : i32
    return %c0_i32, %c0_i32_0 : i32, i32
  }
  func.func @transform_2(%arg0: i32, %arg1: i32) -> (i32, i32) {
    %c0_i32 = arith.constant 0 : i32
    %c0_i32_0 = arith.constant 0 : i32
    %c0_i32_1 = arith.constant 0 : i32
    return %c0_i32, %c0_i32_0 : i32, i32
  }
  func.func @transform_3(%arg0: i32, %arg1: i32) -> (i32, i32, i32, i32) {
    %c0_i32 = arith.constant 0 : i32
    %c0_i32_0 = arith.constant 0 : i32
    %c0_i32_1 = arith.constant 0 : i32
    return %arg0, %arg1, %c0_i32, %c0_i32_0 : i32, i32, i32, i32
  }
  func.func @transform_4(%arg0: i32, %arg1: i32) -> (i32, i32, i32, i32) {
    %c0_i32 = arith.constant 0 : i32
    %c0_i32_0 = arith.constant 0 : i32
    %c0_i32_1 = arith.constant 0 : i32
    return %arg0, %arg1, %c0_i32, %c0_i32_0 : i32, i32, i32, i32
  }
}

module attributes {stable_mosaic.version = 11 : i64} {
  func.func @_bn_relu_pool_kernel(%arg0: i32, %arg1: memref<1x8x8x128xbf16, #tpu.memory_space<vmem>>, %arg2: memref<1x128xf32, #tpu.memory_space<vmem>>, %arg3: memref<1x128xf32, #tpu.memory_space<vmem>>, %arg4: memref<1x4x4x128xf32, #tpu.memory_space<vmem>>, %arg5: memref<10x10x128xf32, #tpu.memory_space<vmem>>, %arg6: memref<4x10x128xf32, #tpu.memory_space<vmem>>) attributes {dimension_semantics = [#tpu.dimension_semantics<parallel>], iteration_bounds = array<i64: 2>, scalar_prefetch = 0 : i64, scratch_operands = 2 : i64, tpu.core_type = #tpu.core_type<tc>, window_params = [{transform_indices = @transform_0, window_bounds = array<i64: 1, 8, 8, 128>}, {pipeline_mode = #tpu.pipeline_mode<synchronous>, transform_indices = @transform_1, window_bounds = array<i64: 1, 128>}, {pipeline_mode = #tpu.pipeline_mode<synchronous>, transform_indices = @transform_2, window_bounds = array<i64: 1, 128>}, {transform_indices = @transform_3, window_bounds = array<i64: 1, 4, 4, 128>}]} {
    %c0 = arith.constant 0 : index
    %c0_0 = arith.constant 0 : index
    %c0_1 = arith.constant 0 : index
    %c0_2 = arith.constant 0 : index
    %0 = vector.load %arg1[%c0, %c0_0, %c0_1, %c0_2] : memref<1x8x8x128xbf16, #tpu.memory_space<vmem>>, vector<1x8x8x128xbf16>
    %1 = vector.shape_cast %0 : vector<1x8x8x128xbf16> to vector<8x8x128xbf16>
    %2 = arith.extf %1 : vector<8x8x128xbf16> to vector<8x8x128xf32>
    %c0_3 = arith.constant 0 : index
    %c0_4 = arith.constant 0 : index
    %3 = vector.load %arg2[%c0_3, %c0_4] : memref<1x128xf32, #tpu.memory_space<vmem>>, vector<1x128xf32>
    %4 = vector.shape_cast %3 : vector<1x128xf32> to vector<128xf32>
    %5 = vector.shape_cast %4 : vector<128xf32> to vector<1x1x128xf32>
    %6 = vector.broadcast %5 : vector<1x1x128xf32> to vector<8x8x128xf32>
    %7 = arith.mulf %2, %6 : vector<8x8x128xf32>
    %c0_5 = arith.constant 0 : index
    %c0_6 = arith.constant 0 : index
    %8 = vector.load %arg3[%c0_5, %c0_6] : memref<1x128xf32, #tpu.memory_space<vmem>>, vector<1x128xf32>
    %9 = vector.shape_cast %8 : vector<1x128xf32> to vector<128xf32>
    %10 = vector.shape_cast %9 : vector<128xf32> to vector<1x1x128xf32>
    %11 = vector.broadcast %10 : vector<1x1x128xf32> to vector<8x8x128xf32>
    %12 = arith.addf %7, %11 : vector<8x8x128xf32>
    %cst = arith.constant 0.000000e+00 : f32
    %13 = vector.broadcast %cst : f32 to vector<8x8x128xf32>
    %14 = arith.maximumf %12, %13 : vector<8x8x128xf32>
    %cst_7 = arith.constant 0.000000e+00 : f32
    %15 = vector.broadcast %cst_7 : f32 to vector<1x10x128xf32>
    %c0_8 = arith.constant 0 : index
    %c0_9 = arith.constant 0 : index
    %c0_10 = arith.constant 0 : index
    %16 = vector.load %arg5[%c0_8, %c0_9, %c0_10] : memref<10x10x128xf32, #tpu.memory_space<vmem>>, vector<1x10x128xf32>
    tpu.vector_store %arg5[%c0_8, %c0_9, %c0_10], %15 {strides = array<i32>} : memref<10x10x128xf32, #tpu.memory_space<vmem>>, vector<1x10x128xf32>,
    %cst_11 = arith.constant 0.000000e+00 : f32
    %17 = vector.broadcast %cst_11 : f32 to vector<1x10x128xf32>
    %c9 = arith.constant 9 : index
    %c0_12 = arith.constant 0 : index
    %c0_13 = arith.constant 0 : index
    %18 = vector.load %arg5[%c9, %c0_12, %c0_13] : memref<10x10x128xf32, #tpu.memory_space<vmem>>, vector<1x10x128xf32>
    tpu.vector_store %arg5[%c9, %c0_12, %c0_13], %17 {strides = array<i32>} : memref<10x10x128xf32, #tpu.memory_space<vmem>>, vector<1x10x128xf32>,
    %cst_14 = arith.constant 0.000000e+00 : f32
    %19 = vector.broadcast %cst_14 : f32 to vector<10x1x128xf32>
    %c0_15 = arith.constant 0 : index
    %c0_16 = arith.constant 0 : index
    %c0_17 = arith.constant 0 : index
    %20 = vector.load %arg5[%c0_15, %c0_16, %c0_17] : memref<10x10x128xf32, #tpu.memory_space<vmem>>, vector<10x1x128xf32>
    tpu.vector_store %arg5[%c0_15, %c0_16, %c0_17], %19 {strides = array<i32>} : memref<10x10x128xf32, #tpu.memory_space<vmem>>, vector<10x1x128xf32>,
    %cst_18 = arith.constant 0.000000e+00 : f32
    %21 = vector.broadcast %cst_18 : f32 to vector<10x1x128xf32>
    %c0_19 = arith.constant 0 : index
    %c9_20 = arith.constant 9 : index
    %c0_21 = arith.constant 0 : index
    %22 = vector.load %arg5[%c0_19, %c9_20, %c0_21] : memref<10x10x128xf32, #tpu.memory_space<vmem>>, vector<10x1x128xf32>
    tpu.vector_store %arg5[%c0_19, %c9_20, %c0_21], %21 {strides = array<i32>} : memref<10x10x128xf32, #tpu.memory_space<vmem>>, vector<10x1x128xf32>,
    %c1 = arith.constant 1 : index
    %c1_22 = arith.constant 1 : index
    %c0_23 = arith.constant 0 : index
    %23 = vector.load %arg5[%c1, %c1_22, %c0_23] : memref<10x10x128xf32, #tpu.memory_space<vmem>>, vector<8x8x128xf32>
    tpu.vector_store %arg5[%c1, %c1_22, %c0_23], %14 {strides = array<i32>} : memref<10x10x128xf32, #tpu.memory_space<vmem>>, vector<8x8x128xf32>,
    %c0_24 = arith.constant 0 : index
    %c0_25 = arith.constant 0 : index
    %c0_26 = arith.constant 0 : index
    %24 = vector.load %arg5[%c0_24, %c0_25, %c0_26] : memref<10x10x128xf32, #tpu.memory_space<vmem>>, vector<8x10x128xf32>
    %25 = vector.shape_cast %24 : vector<8x10x128xf32> to vector<4x2x10x128xf32>
    %c2 = arith.constant 2 : index
    %c0_27 = arith.constant 0 : index
    %c0_28 = arith.constant 0 : index
    %26 = vector.load %arg5[%c2, %c0_27, %c0_28] : memref<10x10x128xf32, #tpu.memory_space<vmem>>, vector<8x10x128xf32>
    %27 = vector.shape_cast %26 : vector<8x10x128xf32> to vector<4x2x10x128xf32>
    %28 = vector.extract_strided_slice %25 {offsets = [0, 0, 0, 0], sizes = [4, 1, 10, 128], strides = [1, 1, 1, 1]} : vector<4x2x10x128xf32> to vector<4x1x10x128xf32>
    %29 = vector.shape_cast %28 : vector<4x1x10x128xf32> to vector<4x10x128xf32>
    %30 = vector.extract_strided_slice %25 {offsets = [0, 1, 0, 0], sizes = [4, 1, 10, 128], strides = [1, 1, 1, 1]} : vector<4x2x10x128xf32> to vector<4x1x10x128xf32>
    %31 = vector.shape_cast %30 : vector<4x1x10x128xf32> to vector<4x10x128xf32>
    %32 = arith.maximumf %29, %31 : vector<4x10x128xf32>
    %33 = vector.extract_strided_slice %27 {offsets = [0, 0, 0, 0], sizes = [4, 1, 10, 128], strides = [1, 1, 1, 1]} : vector<4x2x10x128xf32> to vector<4x1x10x128xf32>
    %34 = vector.shape_cast %33 : vector<4x1x10x128xf32> to vector<4x10x128xf32>
    %35 = arith.maximumf %32, %34 : vector<4x10x128xf32>
    %c0_29 = arith.constant 0 : index
    %c0_30 = arith.constant 0 : index
    %c0_31 = arith.constant 0 : index
    %36 = vector.load %arg6[%c0_29, %c0_30, %c0_31] : memref<4x10x128xf32, #tpu.memory_space<vmem>>, vector<4x10x128xf32>
    tpu.vector_store %arg6[%c0_29, %c0_30, %c0_31], %35 {strides = array<i32>} : memref<4x10x128xf32, #tpu.memory_space<vmem>>, vector<4x10x128xf32>,
    %c0_32 = arith.constant 0 : index
    %c0_33 = arith.constant 0 : index
    %c0_34 = arith.constant 0 : index
    %37 = tpu.strided_load %arg6[%c0_32, %c0_33, %c0_34] {strides = array<i32: 1, 2, 1>} : memref<4x10x128xf32, #tpu.memory_space<vmem>>, vector<4x4x128xf32>
    %c0_35 = arith.constant 0 : index
    %c1_36 = arith.constant 1 : index
    %c0_37 = arith.constant 0 : index
    %38 = tpu.strided_load %arg6[%c0_35, %c1_36, %c0_37] {strides = array<i32: 1, 2, 1>} : memref<4x10x128xf32, #tpu.memory_space<vmem>>, vector<4x4x128xf32>
    %c0_38 = arith.constant 0 : index
    %c2_39 = arith.constant 2 : index
    %c0_40 = arith.constant 0 : index
    %39 = tpu.strided_load %arg6[%c0_38, %c2_39, %c0_40] {strides = array<i32: 1, 2, 1>} : memref<4x10x128xf32, #tpu.memory_space<vmem>>, vector<4x4x128xf32>
    %40 = arith.maximumf %37, %38 : vector<4x4x128xf32>
    %41 = arith.maximumf %40, %39 : vector<4x4x128xf32>
    %c0_41 = arith.constant 0 : index
    %c0_42 = arith.constant 0 : index
    %c0_43 = arith.constant 0 : index
    %c0_44 = arith.constant 0 : index
    %42 = vector.load %arg4[%c0_41, %c0_42, %c0_43, %c0_44] : memref<1x4x4x128xf32, #tpu.memory_space<vmem>>, vector<1x4x4x128xf32>
    %43 = vector.shape_cast %42 : vector<1x4x4x128xf32> to vector<4x4x128xf32>
    %44 = vector.shape_cast %41 : vector<4x4x128xf32> to vector<1x4x4x128xf32>
    tpu.vector_store %arg4[%c0_41, %c0_42, %c0_43, %c0_44], %44 {strides = array<i32>} : memref<1x4x4x128xf32, #tpu.memory_space<vmem>>, vector<1x4x4x128xf32>,
    return
  }
  func.func @transform_0(%arg0: i32) -> (i32, i32, i32, i32) {
    %c0_i32 = arith.constant 0 : i32
    %c0_i32_0 = arith.constant 0 : i32
    %c0_i32_1 = arith.constant 0 : i32
    %c0_i32_2 = arith.constant 0 : i32
    return %arg0, %c0_i32, %c0_i32_0, %c0_i32_1 : i32, i32, i32, i32
  }
  func.func @transform_1(%arg0: i32) -> (i32, i32) {
    %c0_i32 = arith.constant 0 : i32
    %c0_i32_0 = arith.constant 0 : i32
    %c0_i32_1 = arith.constant 0 : i32
    return %c0_i32, %c0_i32_0 : i32, i32
  }
  func.func @transform_2(%arg0: i32) -> (i32, i32) {
    %c0_i32 = arith.constant 0 : i32
    %c0_i32_0 = arith.constant 0 : i32
    %c0_i32_1 = arith.constant 0 : i32
    return %c0_i32, %c0_i32_0 : i32, i32
  }
  func.func @transform_3(%arg0: i32) -> (i32, i32, i32, i32) {
    %c0_i32 = arith.constant 0 : i32
    %c0_i32_0 = arith.constant 0 : i32
    %c0_i32_1 = arith.constant 0 : i32
    %c0_i32_2 = arith.constant 0 : i32
    return %arg0, %c0_i32, %c0_i32_0, %c0_i32_1 : i32, i32, i32, i32
  }
}

</mosaic_0001>

<bundles_post_ra>
// kernel: swift_lane_base_res_block_alter.3
= control target key start
LH: loop header
LB: loop body
LE: loop exit
PB: predicated region body
PF: predicated region fallthrough
CT: control target
= control target key end

     0   :  { %s464_s12 = smov 0   ;;  %s491_s0 = inlined_call_operand.vmem [shape: bf16[2,8,8,128], index: 0, kind: input, shape index: {}]   ;;  %s492_s1 = inlined_call_operand.vmem [shape: f32[1,128], index: 1, kind: input, shape index: {}]   ;;  %s493_s2 = inlined_call_operand.vmem [shape: f32[1,128], index: 2, kind: input, shape index: {}]   ;;  %s494_s3 = inlined_call_operand.vmem [shape: f32[2,4,4,128], index: 3, kind: output, shape index: {}]  }
   0x1 LB: > { %s392_s13 = sadd.s32 4294967295, %s441_s12   ;;  %p396_p0 = scmp.ge.s32.totalorder %s441_s12, 1  ;;  %s441_s12 = sphi %s464_s12, %s13_s12  }
   0x2   : > { %p137_p1 = scmp.lt.s32.totalorder %s441_s12, 3 }
   0x4   : > { %p138_p2 = pnand %p396_p0, %p137_p1 }
   0x5   : > { %p161_p3 = scmp.lt.s32.totalorder (!%p138_p2), %s392_s13, 1 }
   0x6   : > { %141 = sbr.rel (%p138_p2) target bundleno = 64 (0x40), region = 32 }
   0xb   : > { %v443_v0 = vmov 0.0   ;;  %s496_s13 = smov (!%p161_p3, %s392_s13), 1  ;;  %v433_v4 = vld [vmem:[%s492_s1] ss:$0 sm:$0xff] }
   0xc   : > { %219 = vst [vmem:[#allocation2] sm:$0xff] %v443_v0  ;;  %s403_s14 = sshll.u32 %s496_s13, 5  ;;  %v434_v11 = vld [vmem:[%s493_s2] ss:$0 sm:$0xff]  ;;  %s404_s22 = sshll.u32 %s496_s13, 4 }
   0xd   : > { %220 = vst [vmem:[#allocation2 + $0x8] sm:$0x3] %v443_v0  ;;  %s165_s17 = scalar_lea.vmem %s491_s0, %s403_s14  ;;  %s170_s25 = scalar_lea.vmem %s494_s3, %s404_s22 }
   0xe   : > { %224 = vst [vmem:[#allocation2] sm:$0x1] %v443_v0  ;;  %v406_v1 = vld [vmem:[%s165_s17] sm:$0xff]   ;;  %v421_v2 = vld [vmem:[%s165_s17 + $0x8] sm:$0xff]   ;;  %v422_v6 = vld [vmem:[%s165_s17 + $0x10] sm:$0xff]  }
   0xf   : > { %225 = vst [vmem:[#allocation2 + $0x10] sm:$0x1] %v443_v0  ;;  %v407_v3 = vunpack.c.l.bf16 %v406_v1  ;;  %v408_v5 = vunpack.c.h.bf16 %v406_v1  ;;  %v411_v7 = vunpack.c.l.bf16 %v421_v2  ;;  %v412_v8 = vunpack.c.h.bf16 %v421_v2  ;;  %v423_v9 = vld [vmem:[%s165_s17 + $0x18] sm:$0xff]  }
  0x10   : > { %226 = vst [vmem:[#allocation2 + $0x20] sm:$0x1] %v443_v0  ;;  %v415_v12 = vunpack.c.l.bf16 %v422_v6  ;;  %v416_v14 = vunpack.c.h.bf16 %v422_v6  ;;  %v419_v16 = vunpack.c.l.bf16 %v423_v9  ;;  %v420_v18 = vunpack.c.h.bf16 %v423_v9 }
  0x11   : > { %227 = vst [vmem:[#allocation2 + $0x30] sm:$0x1] %v443_v0  ;;  %v191_v10 = vmul.f32 %v433_v4, %v407_v3  ;;  %v192_v13 = vmul.f32 %v433_v4, %v408_v5  ;;  %v193_v15 = vmul.f32 %v433_v4, %v411_v7  ;;  %v194_v17 = vmul.f32 %v433_v4, %v412_v8 }
  0x12   : > { %228 = vst [vmem:[#allocation2 + $0x40] sm:$0x1] %v443_v0  ;;  %v195_v20 = vmul.f32 %v433_v4, %v415_v12  ;;  %v196_v22 = vmul.f32 %v433_v4, %v416_v14  ;;  %v197_v24 = vmul.f32 %v433_v4, %v419_v16  ;;  %v198_v26 = vmul.f32 %v433_v4, %v420_v18 }
  0x13   : > { %229 = vst [vmem:[#allocation2 + $0x50] sm:$0x1] %v443_v0  ;;  %v203_v19 = vadd.f32 %v434_v11, %v191_v10  ;;  %v204_v21 = vadd.f32 %v434_v11, %v192_v13  ;;  %v205_v23 = vadd.f32 %v434_v11, %v193_v15  ;;  %v206_v25 = vadd.f32 %v434_v11, %v194_v17 }
  0x14   : > { %230 = vst [vmem:[#allocation2 + $0x60] sm:$0x1] %v443_v0  ;;  %v207_v28 = vadd.f32 %v434_v11, %v195_v20  ;;  %v208_v30 = vadd.f32 %v434_v11, %v196_v22  ;;  %v209_v32 = vadd.f32 %v434_v11, %v197_v24  ;;  %v210_v34 = vadd.f32 %v434_v11, %v198_v26 }
  0x15   : > { %231 = vst [vmem:[#allocation2 + $0x70] sm:$0x1] %v443_v0  ;;  %v211_v27 = vmax.f32 %v203_v19, 0.0  ;;  %v212_v29 = vmax.f32 %v204_v21, 0.0  ;;  %v213_v31 = vmax.f32 %v205_v23, 0.0  ;;  %v214_v33 = vmax.f32 %v206_v25, 0.0 }
  0x16   : > { %232 = vst [vmem:[#allocation2 + $0x80] sm:$0x1] %v443_v0  ;;  %v215_v35 = vmax.f32 %v207_v28, 0.0  ;;  %v216_v36 = vmax.f32 %v208_v30, 0.0  ;;  %v217_v37 = vmax.f32 %v209_v32, 0.0  ;;  %v218_v38 = vmax.f32 %v210_v34, 0.0 }
  0x17   : > { %235 = vst [vmem:[#allocation2 + $0x19] sm:$0x1] %v443_v0  ;;  %v253_v39 = vld [vmem:[#allocation2] sm:$0xff] }
  0x18   : > { %236 = vst [vmem:[#allocation2 + $0x29] sm:$0x1] %v443_v0 }
  0x19   : > { %237 = vst [vmem:[#allocation2 + $0x39] sm:$0x1] %v443_v0 }
  0x1a   : > { %238 = vst [vmem:[#allocation2 + $0x49] sm:$0x1] %v443_v0 }
  0x1b   : > { %239 = vst [vmem:[#allocation2 + $0x59] sm:$0x1] %v443_v0 }
  0x1c   : > { %240 = vst [vmem:[#allocation2 + $0x69] sm:$0x1] %v443_v0 }
  0x1d   : > { %241 = vst [vmem:[#allocation2 + $0x79] sm:$0x1] %v443_v0 }
  0x1e   : > { %242 = vst [vmem:[#allocation2 + $0x89] sm:$0x1] %v443_v0 }
  0x1f   : > { %234 = vst [vmem:[#allocation2 + $0x9] sm:$0x1] %v443_v0 }
  0x20   : > { %245 = vst [vmem:[#allocation2 + $0x11] sm:$0xff] %v211_v27 }
  0x21   : > { %246 = vst [vmem:[#allocation2 + $0x21] sm:$0xff] %v212_v29 }
  0x22   : > { %247 = vst [vmem:[#allocation2 + $0x31] sm:$0xff] %v213_v31 }
  0x23   : > { %248 = vst [vmem:[#allocation2 + $0x41] sm:$0xff] %v214_v33 }
  0x24   : > { %249 = vst [vmem:[#allocation2 + $0x51] sm:$0xff] %v215_v35 }
  0x25   : > { %250 = vst [vmem:[#allocation2 + $0x61] sm:$0xff] %v216_v36 }
  0x26   : > { %v254_v40 = vld [vmem:[#allocation2 + $0x8] sm:$0x3]  ;;  %251 = vst [vmem:[#allocation2 + $0x71] sm:$0xff] %v217_v37 }
  0x27   : > { %252 = vst [vmem:[#allocation2 + $0x81] sm:$0xff] %v218_v38  ;;  %v255_v41 = vld [vmem:[#allocation2 + $0x10] sm:$0xff]  ;;  %v256_v42 = vld [vmem:[#allocation2 + $0x18] sm:$0x3] }
  0x28   : > { %v270_v43 = vld [vmem:[#allocation2 + $0x20] sm:$0xff]  ;;  %v278_v44 = vmax.f32 %v253_v39, %v255_v41  ;;  %v279_v45 = vmax.f32 %v254_v40, %v256_v42  ;;  %v258_v46 = vld [vmem:[#allocation2 + $0x28] sm:$0x3] }
  0x29   : > { %v271_v47 = vld [vmem:[#allocation2 + $0x28] sm:$0x3]  ;;  %v259_v48 = vld [vmem:[#allocation2 + $0x30] sm:$0xff]  ;;  %v260_v49 = vld [vmem:[#allocation2 + $0x38] sm:$0x3] }
  0x2a   : > { %v286_v50 = vmax.f32 %v278_v44, %v270_v43  ;;  %v287_v51 = vmax.f32 %v279_v45, %v271_v47  ;;  %v272_v52 = vld [vmem:[#allocation2 + $0x40] sm:$0xff]  ;;  %v280_v53 = vmax.f32 %v270_v43, %v259_v48  ;;  %v281_v54 = vmax.f32 %v258_v46, %v260_v49  ;;  %v262_v55 = vld [vmem:[#allocation2 + $0x48] sm:$0x3] }
  0x2b   : > { %v273_v56 = vld [vmem:[#allocation2 + $0x48] sm:$0x3]  ;;  %v263_v57 = vld [vmem:[#allocation2 + $0x50] sm:$0xff]  ;;  %v264_v58 = vld [vmem:[#allocation2 + $0x58] sm:$0x3] }
  0x2c   : > { %294 = vst [vmem:[#allocation3] sm:$0xff] %v286_v50  ;;  %v288_v59 = vmax.f32 %v280_v53, %v272_v52  ;;  %v289_v60 = vmax.f32 %v281_v54, %v273_v56  ;;  %v274_v61 = vld [vmem:[#allocation2 + $0x60] sm:$0xff]  ;;  %v282_v62 = vmax.f32 %v272_v52, %v263_v57  ;;  %v275_v63 = vld [vmem:[#allocation2 + $0x68] sm:$0x3]  ;;  %v283_v0 = vmax.f32 %v262_v55, %v264_v58 }
  0x2d   : > { %v266_v1 = vld [vmem:[#allocation2 + $0x68] sm:$0x3]  ;;  %295 = vst [vmem:[#allocation3 + $0x8] sm:$0x3] %v287_v51  ;;  %v267_v2 = vld [vmem:[#allocation2 + $0x70] sm:$0xff] }
  0x2e   : > { %v268_v3 = vld [vmem:[#allocation2 + $0x78] sm:$0x3]  ;;  %296 = vst [vmem:[#allocation3 + $0x10] sm:$0xff] %v288_v59  ;;  %v290_v4 = vmax.f32 %v282_v62, %v274_v61  ;;  %v291_v5 = vmax.f32 %v283_v0, %v275_v63  ;;  %v276_v6 = vld [vmem:[#allocation2 + $0x80] sm:$0xff]  ;;  %v284_v7 = vmax.f32 %v274_v61, %v267_v2  ;;  %v277_v8 = vld [vmem:[#allocation2 + $0x88] sm:$0x3] }
  0x2f   : > { %v285_v9 = vmax.f32 %v266_v1, %v268_v3  ;;  %297 = vst [vmem:[#allocation3 + $0x18] sm:$0x3] %v289_v60 }
  0x30   : > { %298 = vst [vmem:[#allocation3 + $0x20] sm:$0xff] %v290_v4  ;;  %v292_v10 = vmax.f32 %v284_v7, %v276_v6 }
  0x31   : > { %v293_v11 = vmax.f32 %v285_v9, %v277_v8  ;;  %299 = vst [vmem:[#allocation3 + $0x28] sm:$0x3] %v291_v5 }
  0x32   : > { %300 = vst [vmem:[#allocation3 + $0x30] sm:$0xff] %v292_v10 }
  0x33   : > { %301 = vst [vmem:[#allocation3 + $0x38] sm:$0x3] %v293_v11  ;;  %v302_v12 = vld [vmem:[#allocation3] ss:$2 sm:$0xf] }
  0x34   : > { %v310_v13 = vld [vmem:[#allocation3 + $0x1] ss:$2 sm:$0xf]  ;;  %v318_v17 = vld [vmem:[#allocation3 + $0x2] ss:$2 sm:$0xf] }
  0x35   : > { %v325_v14 = vmax.f32 %v302_v12, %v310_v13  ;;  %v304_v15 = vld [vmem:[#allocation3 + $0x10] ss:$2 sm:$0xf]  ;;  %v312_v16 = vld [vmem:[#allocation3 + $0x11] ss:$2 sm:$0xf] }
  0x36   : > { %v320_v18 = vld [vmem:[#allocation3 + $0x12] ss:$2 sm:$0xf]  ;;  %v326_v19 = vmax.f32 %v304_v15, %v312_v16 }
  0x37   : > { %v329_v20 = vmax.f32 %v325_v14, %v318_v17  ;;  %v306_v21 = vld [vmem:[#allocation3 + $0x20] ss:$2 sm:$0xf]  ;;  %v314_v22 = vld [vmem:[#allocation3 + $0x21] ss:$2 sm:$0xf] }
  0x38   : > { %v330_v23 = vmax.f32 %v326_v19, %v320_v18  ;;  %v322_v24 = vld [vmem:[#allocation3 + $0x22] ss:$2 sm:$0xf]  ;;  %v327_v25 = vmax.f32 %v306_v21, %v314_v22 }
  0x39   : > { %333 = vst [vmem:[%s170_s25] sm:$0xf] %v329_v20  ;;  %v308_v26 = vld [vmem:[#allocation3 + $0x30] ss:$2 sm:$0xf] }
  0x3a   : > { %334 = vst [vmem:[%s170_s25 + $0x4] sm:$0xf] %v330_v23  ;;  %v331_v27 = vmax.f32 %v327_v25, %v322_v24  ;;  %v316_v28 = vld [vmem:[#allocation3 + $0x31] ss:$2 sm:$0xf] }
  0x3b   : > { %v328_v29 = vmax.f32 %v308_v26, %v316_v28  ;;  %v324_v30 = vld [vmem:[#allocation3 + $0x32] ss:$2 sm:$0xf] }
  0x3c   : > { %335 = vst [vmem:[%s170_s25 + $0x8] sm:$0xf] %v331_v27 }
  0x3d   : > { %v332_v31 = vmax.f32 %v328_v29, %v324_v30 }
  0x3f   : > { %336 = vst [vmem:[%s170_s25 + $0xc] sm:$0xf] %v332_v31 }
  0x40 PF: > { %s13_s12 = sadd.s32 1, %s441_s12  }
  0x41   : > { %p10_p4 = scmp.ge.s32.totalorder %s13_s12, 4  }
  0x43   :  { %12 = sbr.rel (!%p10_p4) target bundleno = 1 (0x1), region = 76 }

// kernel: swift_lane_base_res_block_alter.2
= control target key start
LH: loop header
LB: loop body
LE: loop exit
PB: predicated region body
PF: predicated region fallthrough
CT: control target
= control target key end

     0   :  { %s2103_s15 = smov 0   ;;  %s2105_s16 = smov 0   ;;  %s2962_s0 = inlined_call_operand.vmem [shape: bf16[2,11,11,16], index: 0, kind: input, shape index: {}]   ;;  %s2963_s1 = inlined_call_operand.vmem [shape: bf16[256,128], index: 1, kind: input, shape index: {}]   ;;  %s2964_s2 = inlined_call_operand.vmem [shape: f32[1,128], index: 2, kind: input, shape index: {}]   ;;  %s2965_s3 = inlined_call_operand.vmem [shape: bf16[2,8,8,128], index: 3, kind: output, shape index: {0}]   ;;  %s2966_s4 = inlined_call_operand.vmem [shape: f32[2,1,2,128], index: 4, kind: output, shape index: {1}]  }
   0x1   :  { %s2107_s17 = smov 0  }
   0x2 LB: > { %s27_s18 = sadd.s32 1, %s2065_s16  ;;  %p1759_p0 = scmp.ge.s32.totalorder %s2069_s17, 1  ;;  %s2069_s17 = sphi %s2107_s17, %s15_s17   ;;  %s2065_s16 = sphi %s2105_s16, %s2968_s16   ;;  %s2061_s15 = sphi %s2103_s15, %s2967_s15  }
   0x3   : > { %p29_p1 = scmp.ge.s32.totalorder %s27_s18, 2  ;;  %p181_p2 = scmp.lt.s32.totalorder %s2069_s17, 3 }
   0x5   : > { %s2970_s18 = smov (%p29_p1, %s27_s18), 0  ;;  %p182_p3 = pnand %p1759_p0, %p181_p2 }
   0x6   : > { %p218_p4 = scmp.lt.s32.totalorder (!%p182_p3), %s2061_s15, 1  ;;  %s2071_s23 = smov (!%p182_p3), 32  }
   0x7   : > { %185 = sbr.rel (%p182_p3) target bundleno = 631 (0x277), region = 32  ;;  %s2072_s24 = smov (!%p182_p3), 16  }
   0x8   : > { %s2073_s25 = smov (!%p182_p3), 48   ;;  %s2074_s26 = smov (!%p182_p3), 64  }
   0x9   : > { %s2075_s27 = smov (!%p182_p3), 80   ;;  %s2076_s28 = smov (!%p182_p3), 96  }
   0xa   : > { %s2077_s29 = smov (!%p182_p3), 112  }
   0xc   : > { %s2972_s15 = smov (!%p218_p4, %s2061_s15), 1  ;;  %vm1072_vm0 = vcmask 130048   ;;  %vm1097_vm1 = vcmask 261120   ;;  %vm1114_vm2 = vcmask 392192   ;;  %vm1131_vm3 = vcmask 523264  }
   0xd   : > { %s2014_s19 = smul.u32 88, %s2972_s15  ;;  %vm1148_vm4 = vcmask 654336   ;;  %vm1165_vm5 = vcmask 785408   ;;  %vm1182_vm6 = vcmask 916480   ;;  %s1763_s5 = sshll.u32 %s2972_s15, 1  ;;  %vm1616_vm7 = vcmask 1040384  }
   0xe   : > { %s239_s7 = scalar_lea.vmem %s2966_s4, %s1763_s5 }
   0xf   : > { %s2127_s22 = scalar_lea.vmem %s2962_s0, %s2014_s19 }
  0x10   : > { %v1814_v0 = vld [vmem:[%s2127_s22] sm:$0xf]  ;;  %v1943_v1 = vld [vmem:[%s2127_s22] sm:$0x30]  ;;  %v1822_v2 = vld [vmem:[%s2127_s22 + $0x10] sm:$0xf] }
  0x11   : > { %v2132_v3 = vor.u32 %v1943_v1, %v1814_v0  ;;  %v1945_v4 = vld [vmem:[%s2127_s22 + $0x10] sm:$0x30]  ;;  %v1830_v5 = vld [vmem:[%s2127_s22 + $0x20] sm:$0xf]  ;;  %v1947_v6 = vld [vmem:[%s2127_s22 + $0x20] sm:$0x30] }
  0x12   : > { %v2137_v7 = vor.u32 %v1945_v4, %v1822_v2  ;;  %v2139_v8 = vor.u32 %v1947_v6, %v1830_v5  ;;  %v1826_v9 = vld [vmem:[%s2127_s22 + $0x18] sm:$0xf]  ;;  %v1946_v10 = vld [vmem:[%s2127_s22 + $0x18] sm:$0x30]  ;;  %v1818_v11 = vld [vmem:[%s2127_s22 + $0x8] sm:$0xf] }
  0x13   : > { %v432_v12 = vrot.slane %v2132_v3, 1  ;;  %v361_v13 = vshrl.u32 %v2132_v3, 16  ;;  %v363_v14 = vshll.u32 %v2132_v3, 16  ;;  %v2147_v15 = vor.u32 %v1946_v10, %v1826_v9  ;;  %v1944_v16 = vld [vmem:[%s2127_s22 + $0x8] sm:$0x30] }
  0x14   : > { %v375_v17 = vshrl.u32 %v2137_v7, 16  ;;  %v377_v18 = vshll.u32 %v2137_v7, 16  ;;  %v391_v19 = vshll.u32 %v2139_v8, 16  ;;  %v1834_v20 = vld [vmem:[%s2127_s22 + $0x28] sm:$0xf]  ;;  %v389_v22 = vshrl.u32 %v2139_v8, 16 }
  0x15   : > { %440 = vrot.lane.b32.xlu2 %v432_v12, %s2071_s23  ;;  %v365_v21 = vrot.slane %v363_v14, 1  ;;  %v1948_v23 = vld [vmem:[%s2127_s22 + $0x28] sm:$0x30]  ;;  %v384_v26 = vshll.u32 %v2147_v15, 16  ;;  %v1819_v27 = vor.u32 %v1944_v16, %v1818_v11  ;;  %v1842_v30 = vld [vmem:[%s2127_s22 + $0x38] sm:$0xf] }
  0x16   : > { %v379_v24 = vrot.slane %v377_v18, 1  ;;  %v393_v25 = vrot.slane %v391_v19, 1  ;;  %v2166_v29 = vor.u32 %v1948_v23, %v1834_v20  ;;  %v1950_v31 = vld [vmem:[%s2127_s22 + $0x38] sm:$0x30]  ;;  %v1838_v32 = vld [vmem:[%s2127_s22 + $0x30] sm:$0xf] }
  0x17   : > { %v366_v28 = vor.u32 %v365_v21, %v361_v13  ;;  %v370_v34 = vshll.u32 %v1819_v27, 16  ;;  %v1949_v35 = vld [vmem:[%s2127_s22 + $0x30] sm:$0x30]  ;;  %v382_v37 = vshrl.u32 %v2147_v15, 16  ;;  %v368_v38 = vshrl.u32 %v1819_v27, 16 }
  0x18   : > { %v380_v33 = vor.u32 %v379_v24, %v375_v17  ;;  %v394_v36 = vor.u32 %v393_v25, %v389_v22  ;;  %v398_v39 = vshll.u32 %v2166_v29, 16  ;;  %v386_v40 = vrot.slane %v384_v26, 1  ;;  %v1767_v25 = vld [vmem:[%s2127_s22 + $0x14] sm:$0x3] }
  0x19   : > { %416 = vrot.lane.b32.xlu0 %v366_v28, %s2072_s24  ;;  %v372_v41 = vrot.slane %v370_v34, 1  ;;  %v1843_v42 = vor.u32 %v1950_v31, %v1842_v30  ;;  %v1839_v43 = vor.u32 %v1949_v35, %v1838_v32  ;;  %v396_v45 = vshrl.u32 %v2166_v29, 16  ;;  %v1846_v28 = vld [vmem:[%s2127_s22 + $0x10] sm:$0xf]  ;;  %v1850_v31 = vld [vmem:[%s2127_s22 + $0x18] sm:$0xf] }
  0x1a   : > { %420 = vrot.lane.b32.xlu1 %v380_v33, %s2072_s24  ;;  %v400_v46 = vrot.slane %v398_v39, 1  ;;  %v387_v48 = vor.u32 %v386_v40, %v382_v37  ;;  %v435_v57 = vrot.slane %v2147_v15, 1  ;;  %v433_v58 = vrot.slane %v1819_v27, 1  ;;  %v1764_v27 = vld [vmem:[%s2127_s22 + $0x8] sm:$0xf] }
  0x1b   : > { %v373_v44 = vor.u32 %v372_v41, %v368_v38  ;;  %v405_v47 = vshll.u32 %v1839_v43, 16  ;;  %v412_v49 = vshll.u32 %v1843_v42, 16  ;;  %v403_v51 = vshrl.u32 %v1839_v43, 16  ;;  %v1766_v30 = vld [vmem:[%s2127_s22 + $0x10] sm:$0xf] }
  0x1c   : > { %v401_v50 = vor.u32 %v400_v46, %v396_v45  ;;  %v410_v53 = vshrl.u32 %v1843_v42, 16  ;;  %v434_v59 = vrot.slane %v2137_v7, 1  ;;  %v438_v60 = vrot.slane %v1839_v43, 1  ;;  %v1952_v32 = vld [vmem:[%s2127_s22 + $0x18] sm:$0x30] }
  0x1d   : > { %424 = vrot.lane.b32.xlu2 %v394_v36, %s2072_s24  ;;  %v407_v52 = vrot.slane %v405_v47, 1  ;;  %v414_v54 = vrot.slane %v412_v49, 1  ;;  %v436_v61 = vrot.slane %v2139_v8, 1  ;;  %v459_v62 = vrot.slane %v368_v38, 1 }
  0x1e   : > { %v460_v63 = vrot.slane %v370_v34, 2  ;;  %v437_v0 = vrot.slane %v2166_v29, 1  ;;  %v456_v2 = vrot.slane %v361_v13, 1  ;;  %v457_v4 = vrot.slane %v363_v14, 2  ;;  %v1951_v29 = vld [vmem:[%s2127_s22 + $0x10] sm:$0x30] }
  0x1f   : > { %v408_v55 = vor.u32 %v407_v52, %v403_v51  ;;  %v415_v56 = vor.u32 %v414_v54, %v410_v53  ;;  %v439_v5 = vrot.slane %v1843_v42, 1  ;;  %v468_v6 = vrot.slane %v389_v22, 1  ;;  %v1768_v22 = vld [vmem:[%s2127_s22 + $0x18] sm:$0xf] }
  0x20   : > { %v461_v1 = vor.u32 %v460_v63, %v459_v62  ;;  %v469_v9 = vrot.slane %v391_v19, 2  ;;  %v458_v10 = vor.u32 %v457_v4, %v456_v2  ;;  %v462_v11 = vrot.slane %v375_v17, 1 }
  0x21   : > { %418 = vrot.lane.b32.xlu0 %v373_v44, %s2072_s24  ;;  %v463_v3 = vrot.slane %v377_v18, 2  ;;  %v465_v13 = vrot.slane %v382_v37, 1  ;;  %v466_v14 = vrot.slane %v384_v26, 2  ;;  %v477_v16 = vrot.slane %v410_v53, 1 }
  0x22   : > { %422 = vrot.lane.b32.xlu1 %v387_v48, %s2072_s24  ;;  %v470_v12 = vor.u32 %v469_v9, %v468_v6  ;;  %v478_v17 = vrot.slane %v412_v49, 2  ;;  %v471_v18 = vrot.slane %v396_v45, 1  ;;  %v472_v20 = vrot.slane %v398_v39, 2  ;;  %v1765_v39 = vld [vmem:[%s2127_s22 + $0xc] sm:$0x3] }
  0x23   : > { %v464_v8 = vor.u32 %v463_v3, %v462_v11  ;;  %v467_v19 = vor.u32 %v466_v14, %v465_v13  ;;  %v474_v15 = vrot.slane %v403_v51, 1  ;;  %v475_v21 = vrot.slane %v405_v47, 2 }
  0x24   : > { %v479_v7 = vor.u32 %v478_v17, %v477_v16  ;;  %v473_v23 = vor.u32 %v472_v20, %v471_v18  ;;  %v2221_v24 = vunpack.c.l.b16 %v1768_v22  ;;  %v545_v34 = vunpack.c.l.b16 %v1767_v25  ;;  %v1774_v16 = vld [vmem:[%s2127_s22 + $0x30] sm:$0xf]  ;;  %v1772_v20 = vld [vmem:[%s2127_s22 + $0x28] sm:$0xf] }
  0x25   : > { %426 = vrot.lane.b32.xlu2 %v401_v50, %s2072_s24  ;;  %v476_v26 = vor.u32 %v475_v21, %v474_v15  ;;  %v504_v35 = vunpack.c.l.b16 %v1764_v27  ;;  %v1847_v36 = vor.u32 %v1951_v29, %v1846_v28  ;;  %v505_v37 = vunpack.c.l.b16 %v1766_v30  ;;  %v1773_v29 = vld [vmem:[%s2127_s22 + $0x2c] sm:$0x3]  ;;  %v1798_v30 = vld [vmem:[%s2127_s22 + $0x20] sm:$0xf] }
  0x26   : > { %v514_v33 = vpack.c.b16 %v2221_v24, %v2221_v24  ;;  %v1851_v38 = vor.u32 %v1952_v32, %v1850_v31  ;;  %v544_v44 = vunpack.c.l.b16 %v1765_v39  ;;  %v1775_v31 = vld [vmem:[%s2127_s22 + $0x34] sm:$0x3]  ;;  %v548_v32 = vunpack.c.l.b16 %v1773_v29 }
  0x27   : > { %v2236_v40 = vpack.c.b16 %v545_v34, %v505_v37  ;;  %v512_v41 = vpack.c.b16 %v504_v35, %v504_v35  ;;  %v739_v42 = vshll.u32 %v1847_v36, 16  ;;  %v513_v43 = vpack.c.b16 %v505_v37, %v505_v37 }
  0x28   : > { %v746_v45 = vshll.u32 %v1851_v38, 16  ;;  %v808_v46 = vrot.slane %v1847_v36, 1  ;;  %v737_v47 = vshrl.u32 %v1847_v36, 16  ;;  %v2241_v50 = vpack.c.b16 %v544_v44, %v504_v35 }
  0x29   : > { %428 = vrot.lane.b32.xlu0 %v408_v55, %s2072_s24  ;;  %v741_v48 = vrot.slane %v739_v42, 1  ;;  %v570_v49 = vshll.u32 %v2236_v40, 16  ;;  %v744_v51 = vshrl.u32 %v1851_v38, 16  ;;  %v568_v54 = vshrl.u32 %v2236_v40, 16 }
  0x2a   : > { %430 = vrot.lane.b32.xlu1 %v415_v56, %s2072_s24  ;;  %v748_v52 = vrot.slane %v746_v45, 1  ;;  %v809_v4 = vrot.slane %v1851_v38, 1  ;;  %v833_v6 = vrot.slane %v739_v42, 2  ;;  %v836_v22 = vrot.slane %v746_v45, 2  ;;  %v1796_v38 = vld [vmem:[%s2127_s22 + $0x18] sm:$0xf] }
  0x2b   : > { %v742_v53 = vor.u32 %v741_v48, %v737_v47  ;;  %v572_v55 = vrot.slane %v570_v49, 1  ;;  %v835_v21 = vrot.slane %v744_v51, 1  ;;  %v881_v34 = vunpack.c.l.b16 %v1798_v30  ;;  %v1806_v30 = vld [vmem:[%s2127_s22 + $0x40] sm:$0xf] }
  0x2c   : > { %v749_v56 = vor.u32 %v748_v52, %v744_v51  ;;  %v549_v35 = vunpack.c.l.b16 %v1775_v31  ;;  %v633_v36 = vrot.slane %v2236_v40, 1 }
  0x2d   : > { %446 = vrot.lane.b32.xlu2 %v435_v57, %s2071_s23  ;;  %v563_v57 = vshll.u32 %v2241_v50, 16  ;;  %v573_v62 = vor.u32 %v572_v55, %v568_v54  ;;  %v837_v25 = vor.u32 %v836_v22, %v835_v21  ;;  %v244_v55 = vld [vmem:[%s2127_s22] sm:$0xf] }
  0x31   : > { %442 = vrot.lane.b32.xlu0 %v433_v58, %s2071_s23  ;;  %v1862_v58 = vld [vmem:[%s2127_s22 + $0x30] sm:$0xf] }
  0x32   : > { %444 = vrot.lane.b32.xlu1 %v434_v59, %s2071_s23  ;;  %v1955_v59 = vld [vmem:[%s2127_s22 + $0x30] sm:$0x30] }
  0x33   : > { %v2255_v63 = vor.u32 %v1955_v59, %v1862_v58 }
  0x35   : > { %452 = vrot.lane.b32.xlu2 %v438_v60, %s2071_s23  ;;  %v1866_v60 = vld [vmem:[%s2127_s22 + $0x38] sm:$0xf]  ;;  %v767_v9 = vshll.u32 %v2255_v63, 16  ;;  %v765_v3 = vshrl.u32 %v2255_v63, 16  ;;  %v812_v28 = vrot.slane %v2255_v63, 1 }
  0x36   : > { %v256_v63 = vld [vmem:[%s2127_s22 + $0x30] sm:$0xf] }
  0x37   : > { %v769_v13 = vrot.slane %v767_v9, 1 }
  0x39   : > { %448 = vrot.lane.b32.xlu0 %v436_v61, %s2071_s23  ;;  %v1956_v61 = vld [vmem:[%s2127_s22 + $0x38] sm:$0x30]  ;;  %v770_v17 = vor.u32 %v769_v13, %v765_v3 }
  0x3a   : > { %450 = vrot.lane.b32.xlu1 %v437_v0, %s2071_s23  ;;  %v561_v0 = vshrl.u32 %v2241_v50, 16  ;;  %v2261_v2 = vor.u32 %v1956_v61, %v1866_v60  ;;  %v1799_v60 = vld [vmem:[%s2127_s22 + $0x24] sm:$0x3] }
  0x3c   : > { %v774_v11 = vshll.u32 %v2261_v2, 16  ;;  %v772_v14 = vshrl.u32 %v2261_v2, 16  ;;  %v813_v44 = vrot.slane %v2261_v2, 1  ;;  %v656_v45 = vrot.slane %v561_v0, 1 }
  0x3d   : > { %482 = vrot.lane.b32.xlu2 %v461_v1, %s2073_s25  ;;  %v565_v1 = vrot.slane %v563_v57, 1  ;;  %v660_v2 = vrot.slane %v570_v49, 2 }
  0x41   : > { %454 = vrot.lane.b32.xlu0 %v439_v5, %s2071_s23  ;;  %v832_v5 = vrot.slane %v737_v47, 1 }
  0x42   : > { %480 = vrot.lane.b32.xlu1 %v458_v10, %s2073_s25  ;;  %v566_v10 = vor.u32 %v565_v1, %v561_v0 }
  0x45   : > { %488 = vrot.lane.b32.xlu2 %v470_v12, %s2073_s25  ;;  %v834_v12 = vor.u32 %v833_v6, %v832_v5  ;;  %v847_v5 = vrot.slane %v772_v14, 1  ;;  %v848_v6 = vrot.slane %v774_v11, 2 }
  0x49   : > { %484 = vrot.lane.b32.xlu0 %v464_v8, %s2073_s25  ;;  %v776_v8 = vrot.slane %v774_v11, 1 }
  0x4a   : > { %486 = vrot.lane.b32.xlu1 %v467_v19, %s2073_s25  ;;  %v509_v19 = vunpack.c.l.b16 %v1774_v16 }
  0x4c   : > { %v517_v15 = vpack.c.b16 %v509_v19, %v509_v19  ;;  %v2303_v42 = vpack.c.b16 %v549_v35, %v509_v19  ;;  %v250_v19 = vld [vmem:[%s2127_s22 + $0x18] sm:$0xf]  ;;  %v1807_v35 = vld [vmem:[%s2127_s22 + $0x44] sm:$0x3] }
  0x4d   : > { %494 = vrot.lane.b32.xlu2 %v479_v7, %s2073_s25  ;;  %v777_v7 = vor.u32 %v776_v8, %v772_v14  ;;  %v659_v14 = vrot.slane %v568_v54, 1 }
  0x4e   : > { %v598_v51 = vshll.u32 %v2303_v42, 16 }
  0x4f   : > { %v661_v40 = vor.u32 %v660_v2, %v659_v14  ;;  %v254_v14 = vld [vmem:[%s2127_s22 + $0x28] sm:$0xf] }
  0x51   : > { %490 = vrot.lane.b32.xlu0 %v473_v23, %s2073_s25  ;;  %v508_v23 = vunpack.c.l.b16 %v1772_v20 }
  0x52   : > { %492 = vrot.lane.b32.xlu1 %v476_v26, %s2073_s25 }
  0x53   : > { %v516_v26 = vpack.c.b16 %v508_v23, %v508_v23  ;;  %v2300_v39 = vpack.c.b16 %v548_v32, %v508_v23 }
  0x55   : > { %524 = vrot.lane.b32.xlu2 %v514_v33, %s2074_s26  ;;  %v632_v33 = vrot.slane %v2241_v50, 1  ;;  %v591_v47 = vshll.u32 %v2300_v39, 16  ;;  %v589_v58 = vshrl.u32 %v2300_v39, 16  ;;  %v596_v50 = vshrl.u32 %v2303_v42, 16 }
  0x57   : > { %v593_v59 = vrot.slane %v591_v47, 1 }
  0x59   : > { %520 = vrot.lane.b32.xlu0 %v512_v41, %s2074_s26  ;;  %v889_v41 = vpack.c.b16 %v881_v34, %v881_v34 }
  0x5a   : > { %522 = vrot.lane.b32.xlu1 %v513_v43, %s2074_s26  ;;  %v880_v43 = vunpack.c.l.b16 %v1796_v38 }
  0x5c   : > { %v888_v48 = vpack.c.b16 %v880_v43, %v880_v43 }
  0x5d   : > { %816 = vrot.lane.b32.xlu2 %v808_v46, %s2071_s23  ;;  %v657_v46 = vrot.slane %v563_v57, 2  ;;  %v600_v57 = vrot.slane %v598_v51, 1 }
  0x5f   : > { %v601_v13 = vor.u32 %v600_v57, %v596_v50 }
  0x61   : > { %792 = vrot.lane.b32.xlu0 %v742_v53, %s2072_s24  ;;  %v1797_v53 = vld [vmem:[%s2127_s22 + $0x1c] sm:$0x3] }
  0x62   : > { %794 = vrot.lane.b32.xlu1 %v749_v56, %s2072_s24  ;;  %v658_v56 = vor.u32 %v657_v46, %v656_v45  ;;  %v246_v45 = vld [vmem:[%s2127_s22 + $0x8] sm:$0xf]  ;;  %v925_v46 = vunpack.c.l.b16 %v1807_v35 }
  0x65   : > { %618 = vrot.lane.b32.xlu2 %v573_v62, %s2075_s27  ;;  %v920_v62 = vunpack.c.l.b16 %v1797_v53 }
  0x67   : > { %v2339_v16 = vpack.c.b16 %v920_v62, %v880_v43 }
  0x69   : > { %818 = vrot.lane.b32.xlu0 %v809_v4, %s2071_s23  ;;  %v594_v4 = vor.u32 %v593_v59, %v589_v58  ;;  %v939_v49 = vshll.u32 %v2339_v16, 16  ;;  %v1805_v59 = vld [vmem:[%s2127_s22 + $0x3c] sm:$0x3] }
  0x6a   : > { %616 = vrot.lane.b32.xlu1 %v566_v10, %s2075_s27 }
  0x6d   : > { %856 = vrot.lane.b32.xlu2 %v834_v12, %s2073_s25  ;;  %v921_v12 = vunpack.c.l.b16 %v1799_v60 }
  0x6f   : > { %v2280_v18 = vpop.permute.xlu2 %440  ;;  %v2346_v11 = vpack.c.b16 %v921_v12, %v881_v34 }
  0x71   : > { %800 = vrot.lane.b32.xlu0 %v770_v17, %s2072_s24  ;;  %v849_v17 = vor.u32 %v848_v6, %v847_v5  ;;  %v946_v22 = vshll.u32 %v2346_v11, 16  ;;  %v668_v5 = vrot.slane %v589_v58, 1  ;;  %v669_v6 = vrot.slane %v591_v47, 2 }
  0x72   : > { %802 = vrot.lane.b32.xlu1 %v777_v7, %s2072_s24  ;;  %v844_v7 = vrot.slane %v765_v3, 1 }
  0x73   : > { %v948_v29 = vrot.slane %v946_v22, 1  ;;  %v670_v2 = vor.u32 %v669_v6, %v668_v5 }
  0x75   : > { %530 = vrot.lane.b32.xlu2 %v517_v15, %s2074_s26 }
  0x77   : > { %v2286_v27 = vpop.permute.xlu2 %424 }
  0x79   : > { %858 = vrot.lane.b32.xlu0 %v837_v25, %s2073_s25  ;;  %v937_v25 = vshrl.u32 %v2339_v16, 16 }
  0x7a   : > { %528 = vrot.lane.b32.xlu1 %v516_v26, %s2074_s26  ;;  %v941_v26 = vrot.slane %v939_v49, 1 }
  0x7c   : > { %v942_v34 = vor.u32 %v941_v26, %v937_v25 }
  0x7d   : > { %824 = vrot.lane.b32.xlu2 %v812_v28, %s2071_s23  ;;  %v944_v28 = vshrl.u32 %v2346_v11, 16 }
  0x7f   : > { %v2297_v37 = vpop.permute.xlu2 %426 }
  0x80   : > { %v1090_v58 = vsel %vm1072_vm0, %v254_v14, %v2297_v37 }
  0x81   : > { %640 = vrot.lane.b32.xlu0 %v632_v33, %s2076_s28 }
  0x82   : > { %642 = vrot.lane.b32.xlu1 %v633_v36, %s2076_s28  ;;  %v885_v36 = vunpack.c.l.b16 %v1806_v30  ;;  %v672_v30 = vrot.slane %v598_v51, 2 }
  0x84   : > { %v2394_v62 = vpack.c.b16 %v925_v46, %v885_v36  ;;  %v1035_v46 = vrot.slane %v944_v28, 1 }
  0x85   : > { %898 = vrot.lane.b32.xlu2 %v889_v41, %s2074_s26  ;;  %v949_v41 = vor.u32 %v948_v29, %v944_v28  ;;  %v671_v29 = vrot.slane %v596_v50, 1 }
  0x87   : > { %v447_v52 = vpop.permute.xlu2 %446 }
  0x89   : > { %826 = vrot.lane.b32.xlu0 %v813_v44, %s2071_s23  ;;  %v1804_v44 = vld [vmem:[%s2127_s22 + $0x38] sm:$0xf] }
  0x8a   : > { %896 = vrot.lane.b32.xlu1 %v888_v48, %s2074_s26  ;;  %v248_v48 = vld [vmem:[%s2127_s22 + $0x10] sm:$0xf]  ;;  %v884_v53 = vunpack.c.l.b16 %v1804_v44 }
  0x8b   : > { %v417_v61 = vpop.permute.xlu0 %416 }
  0x8c   : > { %v2323_v0 = vpop.permute.xlu1 %420  ;;  %v1075_v1 = vsel %vm1072_vm0, %v244_v55, %v417_v61 }
  0x8d   : > { %680 = vrot.lane.b32.xlu2 %v658_v56, %s2077_s29  ;;  %v2335_v10 = vsel %vm1097_vm1, %v1075_v1, %v2280_v18  ;;  %v845_v18 = vrot.slane %v767_v9, 2  ;;  %v636_v9 = vrot.slane %v2300_v39, 1  ;;  %v1081_v57 = vsel %vm1072_vm0, %v248_v48, %v2323_v0 }
  0x8e   : > { %v637_v1 = vrot.slane %v2303_v42, 1  ;;  %v892_v0 = vpack.c.b16 %v884_v53, %v884_v53  ;;  %v673_v42 = vor.u32 %v672_v30, %v671_v29  ;;  %v1036_v48 = vrot.slane %v946_v22, 2 }
  0x8f   : > { %v453_v8 = vpop.permute.xlu2 %452  ;;  %v846_v54 = vor.u32 %v845_v18, %v844_v7 }
  0x90   : > { %v1037_v22 = vor.u32 %v1036_v48, %v1035_v46  ;;  %v1966_v46 = vld [vmem:[%s2963_s1 + $0x38] sm:$0xff] }
  0x91   : > { %624 = vrot.lane.b32.xlu0 %v594_v4, %s2075_s27  ;;  %1499 = vmatpush.bf16.msra.mxu0 %v1966_v46 }
  0x92   : > { %626 = vrot.lane.b32.xlu1 %v601_v13, %s2075_s27  ;;  %v924_v13 = vunpack.c.l.b16 %v1805_v59  ;;  %v1854_v59 = vld [vmem:[%s2127_s22 + $0x20] sm:$0xf]  ;;  %1998 = vmatpush.bf16.msra.mxu2 %v1966_v46  ;;  %v1961_v46 = vld [vmem:[%s2963_s1 + $0x10] sm:$0xff] }
  0x93   : > { %v419_v20 = vpop.permute.xlu0 %418 }
  0x94   : > { %v423_v15 = vpop.permute.xlu1 %422  ;;  %v1078_v55 = vsel %vm1072_vm0, %v246_v45, %v419_v20  ;;  %v2410_v7 = vpack.c.b16 %v924_v13, %v884_v53  ;;  %v1033_v45 = vrot.slane %v939_v49, 2  ;;  %v1769_v53 = vld [vmem:[%s2127_s22 + $0x1c] sm:$0x3]  ;;  %v1770_v13 = vld [vmem:[%s2127_s22 + $0x20] sm:$0xf] }
  0x95   : > { %v1084_v21 = vsel %vm1072_vm0, %v250_v19, %v423_v15  ;;  %866 = vrot.lane.b32.xlu2 %v849_v17, %s2073_s25  ;;  %v252_v17 = vld [vmem:[%s2127_s22 + $0x20] sm:$0xf]  ;;  %v974_v19 = vshll.u32 %v2394_v62, 16  ;;  %v1008_v15 = vrot.slane %v2339_v16, 1 }
  0x96   : > { %v2359_v3 = vsel %vm1097_vm1, %v1084_v21, %v447_v52  ;;  %v893_v52 = vpack.c.b16 %v885_v36, %v885_v36  ;;  %v1087_v39 = vsel %vm1072_vm0, %v252_v17, %v2286_v27  ;;  %v1009_v27 = vrot.slane %v2346_v11, 1 }
  0x97   : > { %v483_v23 = vpop.permute.xlu2 %482  ;;  %v967_v37 = vshll.u32 %v2410_v7, 16  ;;  %v1048_v28 = vrot.slane %v974_v19, 2 }
  0x99   : > { %682 = vrot.lane.b32.xlu0 %v661_v40, %s2077_s29  ;;  %v972_v40 = vshrl.u32 %v2394_v62, 16 }
  0x9a   : > { %864 = vrot.lane.b32.xlu1 %v846_v54, %s2073_s25  ;;  %v976_v54 = vrot.slane %v974_v19, 1 }
  0x9b   : > { %v429_v31 = vpop.permute.xlu0 %428 }
  0x9c   : > { %v2372_v32 = vpop.permute.xlu1 %430  ;;  %v1093_v33 = vsel %vm1072_vm0, %v256_v63, %v429_v31  ;;  %v977_v26 = vor.u32 %v976_v54, %v972_v40  ;;  %v965_v31 = vshrl.u32 %v2410_v7, 16 }
  0x9d   : > { %648 = vrot.lane.b32.xlu2 %v636_v9, %s2076_s28  ;;  %v2380_v38 = vsel %vm1097_vm1, %v1093_v33, %v453_v8  ;;  %v258_v9 = vld [vmem:[%s2127_s22 + $0x38] sm:$0xf]  ;;  %v969_v33 = vrot.slane %v967_v37, 1 }
  0x9e   : > { %v1044_v6 = vrot.slane %v965_v31, 1 }
  0x9f   : > { %v489_v43 = vpop.permute.xlu2 %488  ;;  %v970_v50 = vor.u32 %v969_v33, %v965_v31 }
  0xa1   : > { %992 = vrot.lane.b32.xlu0 %v942_v34, %s2075_s27  ;;  %v1096_v34 = vsel %vm1072_vm0, %v258_v9, %v2372_v32  ;;  %v1032_v32 = vrot.slane %v937_v25, 1 }
  0xa2   : > { %994 = vrot.lane.b32.xlu1 %v949_v41, %s2075_s27 }
  0xa3   : > { %v443_v56 = vpop.permute.xlu0 %442 }
  0xa4   : > { %v445_v60 = vpop.permute.xlu1 %444  ;;  %v1101_v61 = vsel %vm1097_vm1, %v1078_v55, %v443_v56  ;;  %v1047_v56 = vrot.slane %v972_v40, 1 }
  0xa5   : > { %v1103_v4 = vsel %vm1097_vm1, %v1081_v57, %v445_v60  ;;  %906 = vrot.lane.b32.xlu2 %v893_v52, %s2074_s26  ;;  %v2404_v12 = vsel %vm1114_vm2, %v1101_v61, %v483_v23  ;;  %v1034_v52 = vor.u32 %v1033_v45, %v1032_v32  ;;  %v1953_v57 = vld [vmem:[%s2127_s22 + $0x20] sm:$0x30]  ;;  %v1858_v61 = vld [vmem:[%s2127_s22 + $0x28] sm:$0xf]  ;;  %v1780_v32 = vld [vmem:[%s2127_s22 + $0x10] sm:$0xf] }
  0xa6   : > { %v2478_v5 = vor.u32 %v1953_v57, %v1854_v59  ;;  %v1965_v59 = vld [vmem:[%s2963_s1 + $0x30] sm:$0xff]  ;;  %v1782_v57 = vld [vmem:[%s2127_s22 + $0x18] sm:$0xf] }
  0xa7   : > { %v495_v8 = vpop.permute.xlu2 %494  ;;  %1500 = vmatpush.bf16.msra.mxu0 %v1965_v59  ;;  %1999 = vmatpush.bf16.msra.mxu2 %v1965_v59  ;;  %v1800_v59 = vld [vmem:[%s2127_s22 + $0x28] sm:$0xf] }
  0xa9   : > { %650 = vrot.lane.b32.xlu0 %v637_v1, %s2076_s28  ;;  %v1954_v1 = vld [vmem:[%s2127_s22 + $0x28] sm:$0x30] }
  0xaa   : > { %904 = vrot.lane.b32.xlu1 %v892_v0, %s2074_s26  ;;  %v1045_v0 = vrot.slane %v967_v37, 2  ;;  %v1874_v37 = vld [vmem:[%s2127_s22 + $0x48] sm:$0xf] }
  0xab   : > { %v449_v47 = vpop.permute.xlu0 %448 }
  0xac   : > { %v451_v18 = vpop.permute.xlu1 %450  ;;  %v1107_v20 = vsel %vm1097_vm1, %v1087_v39, %v449_v47  ;;  %v1013_v39 = vrot.slane %v2394_v62, 1  ;;  %v507_v47 = vunpack.c.l.b16 %v1770_v13 }
  0xad   : > { %v2420_v21 = vsel %vm1097_vm1, %v1090_v58, %v451_v18  ;;  %688 = vrot.lane.b32.xlu2 %v670_v2, %s2077_s29  ;;  %v2425_v23 = vsel %vm1114_vm2, %v1107_v20, %v489_v43  ;;  %v753_v58 = vshll.u32 %v2478_v5, 16 }
  0xaf   : > { %v525_v63 = vpop.permute.xlu2 %524  ;;  %v755_v40 = vrot.slane %v753_v58, 1 }
  0xb1   : > { %1016 = vrot.lane.b32.xlu0 %v1008_v15, %s2076_s28  ;;  %v1771_v15 = vld [vmem:[%s2127_s22 + $0x24] sm:$0x3] }
  0xb2   : > { %1018 = vrot.lane.b32.xlu1 %v1009_v27, %s2076_s28  ;;  %v547_v29 = vunpack.c.l.b16 %v1771_v15 }
  0xb3   : > { %v455_v35 = vpop.permute.xlu0 %454 }
  0xb4   : > { %v481_v36 = vpop.permute.xlu1 %480  ;;  %v1113_v41 = vsel %vm1097_vm1, %v1096_v34, %v455_v35 }
  0xb5   : > { %v2442_v43 = vsel %vm1114_vm2, %v2335_v10, %v481_v36  ;;  %1002 = vrot.lane.b32.xlu2 %v977_v26, %s2075_s27  ;;  %v2446_v51 = vsel %vm1114_vm2, %v1113_v41, %v495_v8  ;;  %v1012_v10 = vrot.slane %v2410_v7, 1  ;;  %v2482_v8 = vor.u32 %v1954_v1, %v1858_v61  ;;  %v1870_v41 = vld [vmem:[%s2127_s22 + $0x40] sm:$0xf] }
  0xb7   : > { %v2448_v44 = vpop.permute.xlu2 %816  ;;  %v760_v18 = vshll.u32 %v2482_v8, 16  ;;  %v758_v62 = vshrl.u32 %v2482_v8, 16  ;;  %v811_v61 = vrot.slane %v2482_v8, 1 }
  0xb9   : > { %690 = vrot.lane.b32.xlu0 %v673_v42, %s2077_s29  ;;  %v762_v27 = vrot.slane %v760_v18, 1  ;;  %v1957_v42 = vld [vmem:[%s2127_s22 + $0x40] sm:$0x30] }
  0xba   : > { %1000 = vrot.lane.b32.xlu1 %v970_v50, %s2075_s27  ;;  %v2529_v50 = vpack.c.b16 %v547_v29, %v507_v47  ;;  %v2540_v48 = vor.u32 %v1957_v42, %v1870_v41  ;;  %v1788_v29 = vld [vmem:[%s2127_s22 + $0x30] sm:$0xf]  ;;  %v1962_v41 = vld [vmem:[%s2963_s1 + $0x18] sm:$0xff]  ;;  %v841_v42 = vrot.slane %v758_v62, 1 }
  0xbb   : > { %v485_v25 = vpop.permute.xlu0 %484  ;;  %v763_v35 = vor.u32 %v762_v27, %v758_v62  ;;  %v1963_v27 = vld [vmem:[%s2963_s1 + $0x20] sm:$0xff] }
  0xbc   : > { %v487_v16 = vpop.permute.xlu1 %486  ;;  %v1120_v49 = vsel %vm1114_vm2, %v1103_v4, %v485_v25  ;;  %v546_v4 = vunpack.c.l.b16 %v1769_v53  ;;  %v781_v1 = vshll.u32 %v2540_v48, 16 }
  0xbd   : > { %v2465_v55 = vsel %vm1114_vm2, %v2359_v3, %v487_v16  ;;  %1024 = vrot.lane.b32.xlu2 %v1012_v10, %s2076_s28  ;;  %v2469_v11 = vsel %vm1131_vm3, %v1120_v49, %v525_v63  ;;  %v1049_v3 = vor.u32 %v1048_v28, %v1047_v56  ;;  %v1958_v63 = vld [vmem:[%s2127_s22 + $0x48] sm:$0x30] }
  0xbe   : > { %v2485_v14 = vpack.c.b16 %v546_v4, %v2221_v24  ;;  %v1046_v24 = vor.u32 %v1045_v0, %v1044_v6  ;;  %v2521_v34 = vor.u32 %v1958_v63, %v1874_v37  ;;  %v582_v0 = vshrl.u32 %v2529_v50, 16 }
  0xbf   : > { %v2473_v60 = vpop.permute.xlu2 %618 }
  0xc0   : > { %v577_v54 = vshll.u32 %v2485_v14, 16  ;;  %v575_v31 = vshrl.u32 %v2485_v14, 16  ;;  %v788_v10 = vshll.u32 %v2521_v34, 16  ;;  %v786_v56 = vshrl.u32 %v2521_v34, 16 }
  0xc1   : > { %1056 = vrot.lane.b32.xlu0 %v1034_v52, %s2077_s29  ;;  %v810_v52 = vrot.slane %v2478_v5, 1 }
  0xc2   : > { %1058 = vrot.lane.b32.xlu1 %v1037_v22, %s2077_s29  ;;  %v579_v33 = vrot.slane %v577_v54, 1  ;;  %v790_v28 = vrot.slane %v788_v10, 1  ;;  %v584_v22 = vshll.u32 %v2529_v50, 16 }
  0xc3   : > { %v491_v17 = vpop.permute.xlu0 %490 }
  0xc4   : > { %v493_v2 = vpop.permute.xlu1 %492  ;;  %v2489_v19 = vsel %vm1114_vm2, %v2420_v21, %v491_v17  ;;  %v515_v21 = vpack.c.b16 %v507_v47, %v507_v47  ;;  %v580_v45 = vor.u32 %v579_v33, %v575_v31  ;;  %v791_v6 = vor.u32 %v790_v28, %v786_v56  ;;  %v1964_v17 = vld [vmem:[%s2963_s1 + $0x28] sm:$0xff]  ;;  %v1776_v47 = vld [vmem:[%s2127_s22 + $0x38] sm:$0xf] }
  0xc5   : > { %v2493_v7 = vsel %vm1114_vm2, %v2380_v38, %v493_v2  ;;  %1066 = vrot.lane.b32.xlu2 %v1049_v3, %s2077_s29  ;;  %v751_v38 = vshrl.u32 %v2478_v5, 16  ;;  %v586_v13 = vrot.slane %v584_v22, 1  ;;  %v779_v2 = vshrl.u32 %v2540_v48, 16  ;;  %1501 = vmatpush.bf16.msra.mxu0 %v1964_v17  ;;  %v1960_v28 = vld [vmem:[%s2963_s1 + $0x8] sm:$0xff] }
  0xc6   : > { %2000 = vmatpush.bf16.msra.mxu2 %v1964_v17  ;;  %v882_v17 = vunpack.c.l.b16 %v1800_v59 }
  0xc7   : > { %v857_v20 = vpop.permute.xlu2 %856  ;;  %v756_v30 = vor.u32 %v755_v40, %v751_v38  ;;  %v510_v40 = vunpack.c.l.b16 %v1776_v47  ;;  %v838_v33 = vrot.slane %v751_v38, 1 }
  0xc9   : > { %1026 = vrot.lane.b32.xlu0 %v1013_v39, %s2076_s28  ;;  %v783_v39 = vrot.slane %v781_v1, 1  ;;  %1502 = vmatpush.bf16.msra.mxu0 %v1963_v27 }
  0xca   : > { %1064 = vrot.lane.b32.xlu1 %v1046_v24, %s2077_s29  ;;  %2001 = vmatpush.bf16.msra.mxu2 %v1963_v27 }
  0xcb   : > { %v2511_v9 = vpop.permute.xlu0 %520  ;;  %v784_v37 = vor.u32 %v783_v39, %v779_v2  ;;  %v1959_v39 = vld [vmem:[%s2963_s1] sm:$0xff] }
  0xcc   : > { %v2513_v26 = vpop.permute.xlu1 %522 }
  0xcd   : > { %526 = vrot.lane.b32.xlu2 %v515_v21, %s2074_s26  ;;  %v587_v21 = vor.u32 %v586_v13, %v582_v0  ;;  %1503 = vmatpush.bf16.msra.mxu0 %v1962_v41 }
  0xce   : > { %2002 = vmatpush.bf16.msra.mxu2 %v1962_v41 }
  0xcf   : > { %v2525_v36 = vpop.permute.xlu2 %530 }
  0xd1   : > { %796 = vrot.lane.b32.xlu0 %v756_v30, %s2072_s24  ;;  %v518_v30 = vpack.c.b16 %v510_v40, %v510_v40  ;;  %1504 = vmatpush.bf16.msra.mxu0 %v1961_v46 }
  0xd2   : > { %798 = vrot.lane.b32.xlu1 %v763_v35, %s2072_s24  ;;  %v839_v35 = vrot.slane %v753_v58, 2  ;;  %2003 = vmatpush.bf16.msra.mxu2 %v1961_v46 }
  0xd3   : > { %v793_v25 = vpop.permute.xlu0 %792 }
  0xd4   : > { %v795_v16 = vpop.permute.xlu1 %794  ;;  %v1201_v49 = vsel %vm1072_vm0, %v1780_v32, %v793_v25  ;;  %v842_v32 = vrot.slane %v760_v18, 2  ;;  %v840_v58 = vor.u32 %v839_v35, %v838_v33  ;;  %v1778_v18 = vld [vmem:[%s2127_s22 + $0x40] sm:$0xf]  ;;  %v1779_v25 = vld [vmem:[%s2127_s22 + $0x44] sm:$0x3]  ;;  %v814_v33 = vrot.slane %v2540_v48, 1 }
  0xd5   : > { %v1224_v53 = vsel %vm1097_vm1, %v1201_v49, %v2448_v44  ;;  %620 = vrot.lane.b32.xlu2 %v580_v45, %s2075_s27  ;;  %v1204_v3 = vsel %vm1072_vm0, %v1782_v57, %v795_v16  ;;  %v635_v49 = vrot.slane %v2529_v50, 1  ;;  %v1777_v57 = vld [vmem:[%s2127_s22 + $0x3c] sm:$0x3]  ;;  %1505 = vmatpush.bf16.msra.mxu0 %v1960_v28  ;;  %v663_v48 = vrot.slane %v577_v54, 2 }
  0xd6   : > { %v2558_v44 = vsel %vm1114_vm2, %v1224_v53, %v857_v20  ;;  %v843_v8 = vor.u32 %v842_v32, %v841_v42  ;;  %v551_v53 = vunpack.c.l.b16 %v1779_v25  ;;  %2004 = vmatpush.bf16.msra.mxu2 %v1960_v28  ;;  %v550_v47 = vunpack.c.l.b16 %v1777_v57  ;;  %v1802_v32 = vld [vmem:[%s2127_s22 + $0x30] sm:$0xf] }
  0xd7   : > { %v825_v4 = vpop.permute.xlu2 %824  ;;  %v815_v42 = vrot.slane %v2521_v34, 1  ;;  %v883_v46 = vunpack.c.l.b16 %v1802_v32  ;;  %v665_v32 = vrot.slane %v582_v0, 1  ;;  %v1133_v54 = vsel %vm1131_vm3, %v2442_v43, %v2511_v9  ;;  %v1808_v34 = vld [vmem:[%s2127_s22 + $0x48] sm:$0xf] }
  0xd8   : > { %v1135_v43 = vsel %vm1131_vm3, %v2404_v12, %v2513_v26  ;;  %v1970_v12 = vld [vmem:[%s2963_s1 + $0x58] sm:$0xff] }
  0xd9   : > { %820 = vrot.lane.b32.xlu0 %v810_v52, %s2071_s23  ;;  %v511_v52 = vunpack.c.l.b16 %v1778_v18  ;;  %1506 = vmatpush.bf16.msra.mxu0 %v1959_v39  ;;  %v1974_v18 = vld [vmem:[%s2963_s1 + $0x78] sm:$0xff]  ;;  %v891_v59 = vpack.c.b16 %v883_v46, %v883_v46  ;;  %v1152_v26 = vsel %vm1148_vm4, %v1135_v43, %v2473_v60 }
  0xda   : > { %822 = vrot.lane.b32.xlu1 %v811_v61, %s2071_s23  ;;  %2005 = vmatpush.bf16.msra.mxu2 %v1959_v39  ;;  %v1973_v39 = vld [vmem:[%s2963_s1 + $0x70] sm:$0xff] }
  0xdb   : > { %v819_v24 = vpop.permute.xlu0 %818  ;;  %v2630_v13 = vpack.c.b16 %v551_v53, %v511_v52  ;;  %1528 = vmatpush.bf16.msra.mxu1 %v1974_v18  ;;  %2006 = vmatpush.bf16.msra.mxu3 %v1974_v18 }
  0xdc   : > { %v2575_v20 = vpop.permute.xlu1 %616  ;;  %v1226_v15 = vsel %vm1097_vm1, %v1204_v3, %v819_v24  ;;  %v634_v24 = vrot.slane %v2485_v14, 1 }
  0xdd   : > { %806 = vrot.lane.b32.xlu2 %v791_v6, %s2072_s24  ;;  %v519_v6 = vpack.c.b16 %v511_v52, %v511_v52  ;;  %v612_v27 = vshll.u32 %v2630_v13, 16  ;;  %v610_v35 = vshrl.u32 %v2630_v13, 16  ;;  %v1801_v52 = vld [vmem:[%s2127_s22 + $0x2c] sm:$0x3]  ;;  %v639_v43 = vrot.slane %v2630_v13, 1 }
  0xdf   : > { %v2586_v63 = vpop.permute.xlu2 %898  ;;  %v614_v41 = vrot.slane %v612_v27, 1  ;;  %1529 = vmatpush.bf16.msra.mxu1 %v1973_v39  ;;  %2007 = vmatpush.bf16.msra.mxu3 %v1973_v39 }
  0xe1   : > { %622 = vrot.lane.b32.xlu0 %v587_v21, %s2075_s27 }
  0xe2   : > { %804 = vrot.lane.b32.xlu1 %v784_v37, %s2072_s24  ;;  %v2640_v37 = vpack.c.b16 %v550_v47, %v510_v40  ;;  %v922_v47 = vunpack.c.l.b16 %v1801_v52  ;;  %v854_v52 = vrot.slane %v788_v10, 2 }
  0xe3   : > { %v801_v45 = vpop.permute.xlu0 %800 }
  0xe4   : > { %v2602_v38 = vpop.permute.xlu1 %802  ;;  %v1213_v5 = vsel %vm1072_vm0, %v1788_v29, %v801_v45  ;;  %v605_v40 = vshll.u32 %v2640_v37, 16  ;;  %v1803_v45 = vld [vmem:[%s2127_s22 + $0x34] sm:$0x3]  ;;  %v603_v25 = vshrl.u32 %v2640_v37, 16 }
  0xe5   : > { %532 = vrot.lane.b32.xlu2 %v518_v30, %s2074_s26  ;;  %v2610_v62 = vsel %vm1097_vm1, %v1213_v5, %v825_v4 }
  0xe7   : > { %v2614_v16 = vpop.permute.xlu2 %680 }
  0xe9   : > { %860 = vrot.lane.b32.xlu0 %v840_v58, %s2073_s25  ;;  %v615_v58 = vor.u32 %v614_v41, %v610_v35  ;;  %v1972_v41 = vld [vmem:[%s2963_s1 + $0x68] sm:$0xff] }
  0xea   : > { %862 = vrot.lane.b32.xlu1 %v843_v8, %s2073_s25  ;;  %v923_v8 = vunpack.c.l.b16 %v1803_v45  ;;  %v666_v45 = vrot.slane %v584_v22, 2  ;;  %1530 = vmatpush.bf16.msra.mxu1 %v1972_v41  ;;  %v1971_v22 = vld [vmem:[%s2963_s1 + $0x60] sm:$0xff] }
  0xeb   : > { %v859_v61 = vpop.permute.xlu0 %858  ;;  %2008 = vmatpush.bf16.msra.mxu3 %v1972_v41 }
  0xec   : > { %v2624_v4 = vpop.permute.xlu1 %528  ;;  %v2627_v3 = vsel %vm1114_vm2, %v1226_v15, %v859_v61  ;;  %v890_v15 = vpack.c.b16 %v882_v17, %v882_v17  ;;  %v2672_v57 = vpack.c.b16 %v923_v8, %v883_v46  ;;  %v850_v61 = vrot.slane %v779_v2, 1 }
  0xed   : > { %646 = vrot.lane.b32.xlu2 %v635_v49, %s2076_s28  ;;  %v607_v49 = vrot.slane %v605_v40, 1  ;;  %v662_v2 = vrot.slane %v575_v31, 1  ;;  %v667_v46 = vor.u32 %v666_v45, %v665_v32 }
  0xee   : > { %v958_v0 = vshrl.u32 %v2672_v57, 16  ;;  %1531 = vmatpush.bf16.msra.mxu1 %v1971_v22 }
  0xef   : > { %v2636_v21 = vpop.permute.xlu2 %866  ;;  %2009 = vmatpush.bf16.msra.mxu3 %v1971_v22 }
  0xf1   : > { %534 = vrot.lane.b32.xlu0 %v519_v6, %s2074_s26  ;;  %v851_v6 = vrot.slane %v781_v1, 2  ;;  %v960_v1 = vshll.u32 %v2672_v57, 16 }
  0xf2   : > { %644 = vrot.lane.b32.xlu1 %v634_v24, %s2076_s28  ;;  %v608_v24 = vor.u32 %v607_v49, %v603_v25  ;;  %v853_v49 = vrot.slane %v786_v56, 1  ;;  %1532 = vmatpush.bf16.msra.mxu1 %v1970_v12 }
  0xf3   : > { %v641_v29 = vpop.permute.xlu0 %640  ;;  %v962_v50 = vrot.slane %v960_v1, 1  ;;  %2010 = vmatpush.bf16.msra.mxu3 %v1970_v12 }
  0xf4   : > { %v2643_v30 = vpop.permute.xlu1 %642 }
  0xf5   : > { %900 = vrot.lane.b32.xlu2 %v890_v15, %s2074_s26  ;;  %v1169_v10 = vsel %vm1165_vm5, %v1152_v26, %v2643_v30  ;;  %v1811_v26 = vld [vmem:[%s2127_s22 + $0x54] sm:$0x3] }
  0xf7   : > { %v2654_v5 = vpop.permute.xlu2 %648 }
  0xf9   : > { %828 = vrot.lane.b32.xlu0 %v814_v33, %s2071_s23  ;;  %v852_v33 = vor.u32 %v851_v6, %v850_v61 }
  0xfa   : > { %830 = vrot.lane.b32.xlu1 %v815_v42, %s2071_s23  ;;  %v2694_v42 = vpack.c.b16 %v922_v47, %v882_v17  ;;  %v664_v17 = vor.u32 %v663_v48, %v662_v2  ;;  %v855_v47 = vor.u32 %v854_v52, %v853_v49  ;;  %v1809_v2 = vld [vmem:[%s2127_s22 + $0x4c] sm:$0x3]  ;;  %v1011_v49 = vrot.slane %v2672_v57, 1 }
  0xfb   : > { %v2667_v53 = vpop.permute.xlu0 %826  ;;  %v926_v45 = vunpack.c.l.b16 %v1809_v2  ;;  %v677_v2 = vrot.slane %v610_v35, 1 }
  0xfc   : > { %v2669_v28 = vpop.permute.xlu1 %896  ;;  %v953_v8 = vshll.u32 %v2694_v42, 16 }
  0xfd   : > { %630 = vrot.lane.b32.xlu2 %v615_v58, %s2075_s27  ;;  %v1150_v58 = vsel %vm1148_vm4, %v1133_v54, %v2575_v20  ;;  %v963_v20 = vor.u32 %v962_v50, %v958_v0  ;;  %v1968_v54 = vld [vmem:[%s2963_s1 + $0x48] sm:$0xff] }
  0xfe   : > { %v1167_v9 = vsel %vm1165_vm5, %v1150_v58, %v641_v29  ;;  %v951_v29 = vshrl.u32 %v2694_v42, 16  ;;  %v638_v58 = vrot.slane %v2640_v37, 1  ;;  %v1041_v37 = vrot.slane %v958_v0, 1 }
  0xff   : > { %v2683_v15 = vpop.permute.xlu2 %906  ;;  %v1184_v56 = vsel %vm1182_vm6, %v1167_v9, %v2614_v16  ;;  %v1969_v16 = vld [vmem:[%s2963_s1 + $0x50] sm:$0xff] }
 0x100   : > { %1533 = vmatpush.bf16.msra.mxu1 %v1969_v16  ;;  %2011 = vmatpush.bf16.msra.mxu3 %v1969_v16  ;;  %v1810_v9 = vld [vmem:[%s2127_s22 + $0x50] sm:$0xf]  ;;  %v674_v16 = vrot.slane %v603_v25, 1 }
 0x101   : > { %902 = vrot.lane.b32.xlu0 %v891_v59, %s2074_s26  ;;  %v955_v59 = vrot.slane %v953_v8, 1  ;;  %v887_v52 = vunpack.c.l.b16 %v1810_v9 }
 0x102   : > { %628 = vrot.lane.b32.xlu1 %v608_v24, %s2075_s27  ;;  %v1335_v24 = vunpack.c.l.b16 %v1184_v56 }
 0x103   : > { %v2701_v31 = vpop.permute.xlu0 %624  ;;  %v956_v30 = vor.u32 %v955_v59, %v951_v29 }
 0x104   : > { %v2703_v14 = vpop.permute.xlu1 %626  ;;  %1534 = vmatpush.bf16.msra.mxu1 %v1968_v54  ;;  %2012 = vmatpush.bf16.msra.mxu3 %v1968_v54 }
 0x105   : > { %868 = vrot.lane.b32.xlu2 %v852_v33, %s2073_s25  ;;  %v886_v33 = vunpack.c.l.b16 %v1808_v34  ;;  %v895_v34 = vpack.c.b16 %v887_v52, %v887_v52 }
 0x107   : > { %v2722_v18 = vpop.permute.xlu2 %688  ;;  %v894_v32 = vpack.c.b16 %v886_v33, %v886_v33  ;;  %v2766_v22 = vpack.c.b16 %v926_v45, %v886_v33  ;;  %v1141_v45 = vsel %vm1131_vm3, %v2425_v23, %v2624_v4  ;;  %v1143_v23 = vsel %vm1131_vm3, %v2489_v19, %v2525_v36 }
 0x108   : > { %v1158_v13 = vsel %vm1148_vm4, %v1141_v45, %v2701_v31  ;;  %v1038_v19 = vrot.slane %v951_v29, 1  ;;  %v1039_v36 = vrot.slane %v953_v8, 2  ;;  %v1790_v29 = vld [vmem:[%s2127_s22 + $0x38] sm:$0xf] }
 0x109   : > { %684 = vrot.lane.b32.xlu0 %v664_v17, %s2077_s29  ;;  %v981_v12 = vshll.u32 %v2766_v22, 16 }
 0x10a   : > { %686 = vrot.lane.b32.xlu1 %v667_v46, %s2077_s29  ;;  %v1967_v46 = vld [vmem:[%s2963_s1 + $0x40] sm:$0xff] }
 0x10b   : > { %v683_v61 = vpop.permute.xlu0 %682  ;;  %1535 = vmatpush.bf16.msra.mxu1 %v1967_v46  ;;  %2013 = vmatpush.bf16.msra.mxu3 %v1967_v46  ;;  %v1160_v46 = vsel %vm1148_vm4, %v1143_v23, %v2703_v14 }
 0x10c   : > { %v2745_v6 = vpop.permute.xlu1 %864  ;;  %v1186_v60 = vsel %vm1182_vm6, %v1169_v10, %v683_v61  ;;  %v927_v10 = vunpack.c.l.b16 %v1811_v26  ;;  %v979_v61 = vshrl.u32 %v2766_v22, 16  ;;  %v1040_v26 = vor.u32 %v1039_v36, %v1038_v19 }
 0x10d   : > { %v1337_v39 = vunpack.c.l.b16 %v1186_v60  ;;  %998 = vrot.lane.b32.xlu2 %v963_v20, %s2075_s27  ;;  %v983_v60 = vrot.slane %v981_v12, 1  ;;  %v1248_v45 = vsel %vm1114_vm2, %v2610_v62, %v2745_v6 }
 0x10f   : > { %v2755_v48 = vpop.permute.xlu2 %1002  ;;  %v1387_v41 = vpack.c.b16 %v1337_v39, %v1335_v24  ;;  %v1010_v39 = vrot.slane %v2694_v42, 1  ;;  %v2789_v24 = vpack.c.b16 %v927_v10, %v887_v52  ;;  %v984_v33 = vor.u32 %v983_v60, %v979_v61 }
 0x110   : > { %v1050_v10 = vrot.slane %v979_v61, 1  ;;  %v1051_v60 = vrot.slane %v981_v12, 2  ;;  %v1256_v42 = vsel %vm1131_vm3, %v2558_v44, %v2669_v28 }
 0x111   : > { %870 = vrot.lane.b32.xlu0 %v855_v47, %s2073_s25  ;;  %1507 = vmatmul.bf16.vlgmr.msra.gmra.mxu0 %v1387_v41  ;;  %v678_v41 = vrot.slane %v612_v27, 2  ;;  %v988_v35 = vshll.u32 %v2789_v24, 16  ;;  %v986_v57 = vshrl.u32 %v2789_v24, 16 }
 0x112   : > { %996 = vrot.lane.b32.xlu1 %v956_v30, %s2075_s27  ;;  %v675_v30 = vrot.slane %v605_v40, 2  ;;  %v1042_v40 = vrot.slane %v960_v1, 2  ;;  %v1052_v8 = vor.u32 %v1051_v60, %v1050_v10 }
 0x113   : > { %v2762_v17 = vpop.permute.xlu0 %992  ;;  %v679_v27 = vor.u32 %v678_v41, %v677_v2  ;;  %v990_v1 = vrot.slane %v988_v35, 1  ;;  %v1014_v2 = vrot.slane %v2766_v22, 1 }
 0x114   : > { %v2764_v50 = vpop.permute.xlu1 %994  ;;  %v676_v25 = vor.u32 %v675_v30, %v674_v16  ;;  %v1043_v0 = vor.u32 %v1042_v40, %v1041_v37  ;;  %v1053_v37 = vrot.slane %v986_v57, 1 }
 0x115   : > { %908 = vrot.lane.b32.xlu2 %v894_v32, %s2074_s26 }
 0x117   : > { %v2775_v20 = vpop.permute.xlu2 %1024 }
 0x119   : > { %652 = vrot.lane.b32.xlu0 %v638_v58, %s2076_s28  ;;  %v1175_v58 = vsel %vm1165_vm5, %v1158_v13, %v2654_v5 }
 0x11a   : > { %654 = vrot.lane.b32.xlu1 %v639_v43, %s2076_s28  ;;  %v1192_v31 = vsel %vm1182_vm6, %v1175_v58, %v2722_v18  ;;  %v991_v18 = vor.u32 %v990_v1, %v986_v57 }
 0x11b   : > { %v651_v59 = vpop.permute.xlu0 %650  ;;  %v1343_v52 = vunpack.c.l.b16 %v1192_v31  ;;  %v1784_v31 = vld [vmem:[%s2127_s22 + $0x20] sm:$0xf] }
 0x11c   : > { %v2782_v56 = vpop.permute.xlu1 %904  ;;  %v1177_v5 = vsel %vm1165_vm5, %v1160_v46, %v651_v59  ;;  %v1258_v59 = vsel %vm1131_vm3, %v2627_v3, %v2586_v63  ;;  %v1216_v63 = vsel %vm1072_vm0, %v1790_v29, %v2602_v38  ;;  %v1786_v46 = vld [vmem:[%s2127_s22 + $0x28] sm:$0xf]  ;;  %v1792_v29 = vld [vmem:[%s2127_s22 + $0x40] sm:$0xf] }
 0x11d   : > { %1022 = vrot.lane.b32.xlu2 %v1011_v49, %s2076_s28  ;;  %v1274_v12 = vsel %vm1148_vm4, %v1258_v59, %v2764_v50  ;;  %v1234_v50 = vsel %vm1097_vm1, %v1216_v63, %v2667_v53  ;;  %v1264_v38 = vsel %vm1131_vm3, %v1248_v45, %v2782_v56  ;;  %v1054_v53 = vrot.slane %v988_v35, 2  ;;  %v1794_v59 = vld [vmem:[%s2127_s22 + $0x48] sm:$0xf] }
 0x11f   : > { %v2787_v47 = vpop.permute.xlu2 %1066 }
 0x121   : > { %910 = vrot.lane.b32.xlu0 %v895_v34, %s2074_s26 }
 0x122   : > { %1020 = vrot.lane.b32.xlu1 %v1010_v39, %s2076_s28  ;;  %v1272_v39 = vsel %vm1148_vm4, %v1256_v42, %v2762_v17 }
 0x123   : > { %v1017_v32 = vpop.permute.xlu0 %1016 }
 0x124   : > { %v1019_v54 = vpop.permute.xlu1 %1018  ;;  %v1288_v44 = vsel %vm1165_vm5, %v1272_v39, %v1017_v32  ;;  %v1015_v32 = vrot.slane %v2789_v24, 1 }
 0x125   : > { %1004 = vrot.lane.b32.xlu2 %v984_v33, %s2075_s27  ;;  %v1290_v61 = vsel %vm1165_vm5, %v1274_v12, %v1019_v54 }
 0x127   : > { %v2815_v4 = vpop.permute.xlu2 %526 }
 0x129   : > { %692 = vrot.lane.b32.xlu0 %v676_v25, %s2077_s29  ;;  %v1250_v25 = vsel %vm1114_vm2, %v1234_v50, %v2636_v21 }
 0x12a   : > { %694 = vrot.lane.b32.xlu1 %v679_v27, %s2077_s29  ;;  %v1266_v24 = vsel %vm1131_vm3, %v1250_v25, %v2683_v15  ;;  %v1055_v27 = vor.u32 %v1054_v53, %v1053_v37 }
 0x12b   : > { %v691_v43 = vpop.permute.xlu0 %690  ;;  %v1282_v62 = vsel %vm1148_vm4, %v1266_v24, %v2755_v48 }
 0x12c   : > { %v1001_v9 = vpop.permute.xlu1 %1000  ;;  %v1194_v49 = vsel %vm1182_vm6, %v1177_v5, %v691_v43 }
 0x12d   : > { %v1345_v14 = vunpack.c.l.b16 %v1194_v49  ;;  %1062 = vrot.lane.b32.xlu2 %v1043_v0, %s2077_s29  ;;  %v1280_v22 = vsel %vm1148_vm4, %v1264_v38, %v1001_v9 }
 0x12e   : > { %v1296_v40 = vsel %vm1165_vm5, %v1280_v22, %v2775_v20 }
 0x12f   : > { %v1391_v34 = vpack.c.b16 %v1345_v14, %v1343_v52  ;;  %v2843_v33 = vpop.permute.xlu2 %620 }
 0x131   : > { %1006 = vrot.lane.b32.xlu0 %v991_v18, %s2075_s27  ;;  %1517 = vmatmul.bf16.vlgmr.msra.gmra.mxu2 %v1391_v34  ;;  %s1942_s27 = sshll.u32 %s2972_s15, 5 }
 0x132   : > { %1060 = vrot.lane.b32.xlu1 %v1040_v26, %s2077_s29  ;;  %s2943_s30 = scalar_lea.vmem %s2965_s3, %s1942_s27 }
 0x133   : > { %v1057_v28 = vpop.permute.xlu0 %1056 }
 0x134   : > { %v1059_v16 = vpop.permute.xlu1 %1058  ;;  %v1304_v30 = vsel %vm1182_vm6, %v1288_v44, %v1057_v28 }
 0x135   : > { %v1306_v3 = vsel %vm1182_vm6, %v1290_v61, %v1059_v16  ;;  %v1336_v17 = vunpack.c.l.b16 %v1304_v30  ;;  %1068 = vrot.lane.b32.xlu2 %v1052_v8, %s2077_s29 }
 0x136   : > { %v1338_v41 = vunpack.c.l.b16 %v1306_v3 }
 0x137   : > { %v807_v56 = vpop.permute.xlu2 %806 }
 0x138   : > { %v1388_v54 = vpack.c.b16 %v1338_v41, %v1336_v17  ;;  %v1222_v44 = vsel %vm1072_vm0, %v1794_v59, %v807_v56  ;;  %v1139_v17 = vsel %vm1131_vm3, %v2465_v55, %v2815_v4  ;;  %v1154_v41 = vsel %vm1148_vm4, %v2469_v11, %v2843_v33 }
 0x139   : > { %1028 = vrot.lane.b32.xlu0 %v1014_v2, %s2076_s28 }
 0x13a   : > { %1030 = vrot.lane.b32.xlu1 %v1015_v32, %s2076_s28  ;;  %1536 = vmatmul.bf16.vlgmr.msra.gmra.mxu1 %v1388_v54 }
 0x13b   : > { %v1027_v6 = vpop.permute.xlu0 %1026 }
 0x13c   : > { %v1065_v21 = vpop.permute.xlu1 %1064  ;;  %v1298_v13 = vsel %vm1165_vm5, %v1282_v62, %v1027_v6 }
 0x13d   : > { %v1312_v35 = vsel %vm1182_vm6, %v1296_v40, %v1065_v21  ;;  %v1314_v15 = vsel %vm1182_vm6, %v1298_v13, %v2787_v47 }
 0x13e   : > { %v1344_v23 = vunpack.c.l.b16 %v1312_v35  ;;  %v1346_v58 = vunpack.c.l.b16 %v1314_v15 }
 0x13f   : > { %v533_v1 = vpop.permute.xlu2 %532 }
 0x140   : > { %v1392_v0 = vpack.c.b16 %v1346_v58, %v1344_v23  ;;  %v1145_v35 = vsel %vm1131_vm3, %v2493_v7, %v533_v1 }
 0x141   : > { %1070 = vrot.lane.b32.xlu0 %v1055_v27, %s2077_s29 }
 0x142   : > { %1546 = vmatmul.bf16.vlgmr.msra.gmra.mxu3 %v1392_v0 }
 0x143   : > { %v797_v48 = vpop.permute.xlu0 %796 }
 0x144   : > { %v799_v57 = vpop.permute.xlu1 %798  ;;  %v1207_v19 = vsel %vm1072_vm0, %v1784_v31, %v797_v48 }
 0x145   : > { %v1210_v20 = vsel %vm1072_vm0, %v1786_v46, %v799_v57 }
 0x147   : > { %v647_v9 = vpop.permute.xlu2 %646 }
 0x14b   : > { %v821_v36 = vpop.permute.xlu0 %820 }
 0x14c   : > { %v823_v5 = vpop.permute.xlu1 %822  ;;  %v1228_v47 = vsel %vm1097_vm1, %v1207_v19, %v821_v36 }
 0x14d   : > { %v1230_v43 = vsel %vm1097_vm1, %v1210_v20, %v823_v5 }
 0x14f   : > { %v901_v14 = vpop.permute.xlu2 %900 }
 0x153   : > { %v623_v49 = vpop.permute.xlu0 %622 }
 0x154   : > { %v805_v52 = vpop.permute.xlu1 %804  ;;  %v1156_v50 = vsel %vm1148_vm4, %v1139_v17, %v623_v49 }
 0x155   : > { %v1219_v39 = vsel %vm1072_vm0, %v1792_v29, %v805_v52  ;;  %v1173_v54 = vsel %vm1165_vm5, %v1156_v50, %v647_v9 }
 0x157   : > { %v631_v42 = vpop.permute.xlu2 %630 }
 0x15b   : > { %v861_v18 = vpop.permute.xlu0 %860 }
 0x15c   : > { %v863_v26 = vpop.permute.xlu1 %862  ;;  %v1244_v34 = vsel %vm1114_vm2, %v1228_v47, %v861_v18 }
 0x15d   : > { %v1246_v10 = vsel %vm1114_vm2, %v1230_v43, %v863_v26  ;;  %v1260_v5 = vsel %vm1131_vm3, %v1244_v34, %v901_v14 }
 0x15f   : > { %v869_v30 = vpop.permute.xlu2 %868 }
 0x163   : > { %v535_v60 = vpop.permute.xlu0 %534 }
 0x164   : > { %v645_v8 = vpop.permute.xlu1 %644  ;;  %v1147_v13 = vsel %vm1131_vm3, %v2446_v51, %v535_v60 }
 0x165   : > { %v1171_v32 = vsel %vm1165_vm5, %v1154_v41, %v645_v8  ;;  %v1164_v15 = vsel %vm1148_vm4, %v1147_v13, %v631_v42 }
 0x167   : > { %v999_v2 = vpop.permute.xlu2 %998 }
 0x16b   : > { %v829_v12 = vpop.permute.xlu0 %828 }
 0x16c   : > { %v831_v28 = vpop.permute.xlu1 %830  ;;  %v1236_v61 = vsel %vm1097_vm1, %v1219_v39, %v829_v12 }
 0x16d   : > { %v2894_v16 = vsel %vm1097_vm1, %v1222_v44, %v831_v28  ;;  %v1252_v8 = vsel %vm1114_vm2, %v1236_v61, %v869_v30 }
 0x16f   : > { %v909_v4 = vpop.permute.xlu2 %908 }
 0x170   : > { %v1268_v14 = vsel %vm1131_vm3, %v1252_v8, %v909_v4 }
 0x173   : > { %v903_v63 = vpop.permute.xlu0 %902 }
 0x174   : > { %v629_v3 = vpop.permute.xlu1 %628  ;;  %v1262_v51 = vsel %vm1131_vm3, %v1246_v10, %v903_v63 }
 0x175   : > { %v1162_v27 = vsel %vm1148_vm4, %v1145_v35, %v629_v3  ;;  %v1278_v1 = vsel %vm1148_vm4, %v1262_v51, %v999_v2 }
 0x177   : > { %v1023_v56 = vpop.permute.xlu2 %1022 }
 0x178   : > { %v1294_v36 = vsel %vm1165_vm5, %v1278_v1, %v1023_v56 }
 0x17b   : > { %v685_v45 = vpop.permute.xlu0 %684 }
 0x17c   : > { %v687_v38 = vpop.permute.xlu1 %686  ;;  %v1188_v25 = vsel %vm1182_vm6, %v1171_v32, %v685_v45 }
 0x17d   : > { %v1190_v22 = vsel %vm1182_vm6, %v1173_v54, %v687_v38  ;;  %v1339_v37 = vunpack.c.l.b16 %v1188_v25 }
 0x17e   : > { %v1341_v53 = vunpack.c.l.b16 %v1190_v22 }
 0x17f   : > { %v1005_v40 = vpop.permute.xlu2 %1004 }
 0x180   : > { %v1389_v55 = vpack.c.b16 %v1341_v53, %v1339_v37  ;;  %v1284_v34 = vsel %vm1148_vm4, %v1268_v14, %v1005_v40 }
 0x182   : > { %1512 = vmatmul.bf16.gmra.mxu0 %v1389_v55 }
 0x183   : > { %v871_v24 = vpop.permute.xlu0 %870 }
 0x184   : > { %v997_v62 = vpop.permute.xlu1 %996  ;;  %v1254_v39 = vsel %vm1114_vm2, %v2894_v16, %v871_v24  ;;  %v2046_v16 = vld [vmem:[%s2964_s2] ss:$0 sm:$0xff] }
 0x185   : > { %v1276_v47 = vsel %vm1148_vm4, %v1260_v5, %v997_v62 }
 0x187   : > { %v1063_v19 = vpop.permute.xlu2 %1062 }
 0x188   : > { %v1310_v43 = vsel %vm1182_vm6, %v1294_v36, %v1063_v19 }
 0x189   : > { %v1342_v26 = vunpack.c.l.b16 %v1310_v43 }
 0x18b   : > { %v653_v6 = vpop.permute.xlu0 %652 }
 0x18c   : > { %v655_v11 = vpop.permute.xlu1 %654  ;;  %v1179_v23 = vsel %vm1165_vm5, %v1162_v27, %v653_v6 }
 0x18d   : > { %v1181_v0 = vsel %vm1165_vm5, %v1164_v15, %v655_v11 }
 0x18e   : > { %v1508_v44 = vpop.f32.mrf.mxu0 }
 0x18f   : > { %v1069_v59 = vpop.permute.xlu2 %1068  ;;  %v1509_v38 = vadd.f32 %v2046_v16, %v1508_v44 }
 0x193   : > { %v911_v33 = vpop.permute.xlu0 %910 }
 0x194   : > { %v1021_v21 = vpop.permute.xlu1 %1020  ;;  %v1270_v28 = vsel %vm1131_vm3, %v1254_v39, %v911_v33 }
 0x195   : > { %v1292_v49 = vsel %vm1165_vm5, %v1276_v47, %v1021_v21 }
 0x196   : > { %v1510_v45 = vpop.f32.mrf.mxu0 }
 0x197   : > { %v1511_v54 = vadd.f32 %v2046_v16, %v1510_v45 }
 0x19b   : > { %v693_v58 = vpop.permute.xlu0 %692 }
 0x19c   : > { %v695_v48 = vpop.permute.xlu1 %694  ;;  %v1196_v57 = vsel %vm1182_vm6, %v1179_v23, %v693_v58 }
 0x19d   : > { %v1198_v46 = vsel %vm1182_vm6, %v1181_v0, %v695_v48  ;;  %v1347_v31 = vunpack.c.l.b16 %v1196_v57 }
 0x19e   : > { %v1349_v20 = vunpack.c.l.b16 %v1198_v46 }
 0x1a0   : > { %v1393_v7 = vpack.c.b16 %v1349_v20, %v1347_v31 }
 0x1a2   : > { %1522 = vmatmul.bf16.gmra.mxu2 %v1393_v7 }
 0x1a3   : > { %v1007_v9 = vpop.permute.xlu0 %1006 }
 0x1a4   : > { %v1061_v52 = vpop.permute.xlu1 %1060  ;;  %v1286_v63 = vsel %vm1148_vm4, %v1270_v28, %v1007_v9 }
 0x1a5   : > { %v1308_v18 = vsel %vm1182_vm6, %v1292_v49, %v1061_v52 }
 0x1a6   : > { %v1340_v10 = vunpack.c.l.b16 %v1308_v18 }
 0x1a8   : > { %v1390_v60 = vpack.c.b16 %v1342_v26, %v1340_v10 }
 0x1aa   : > { %1541 = vmatmul.bf16.gmra.mxu1 %v1390_v60 }
 0x1ab   : > { %v1029_v42 = vpop.permute.xlu0 %1028 }
 0x1ac   : > { %v1300_v29 = vsel %vm1165_vm5, %v1284_v34, %v1029_v42  ;;  %v1031_v12 = vpop.permute.xlu1 %1030 }
 0x1ad   : > { %v1316_v3 = vsel %vm1182_vm6, %v1300_v29, %v1069_v59  ;;  %v1302_v61 = vsel %vm1165_vm5, %v1286_v63, %v1031_v12 }
 0x1ae   : > { %v1348_v2 = vunpack.c.l.b16 %v1316_v3 }
 0x1b3   : > { %v1071_v30 = vpop.permute.xlu0 %1070 }
 0x1b4   : > { %v1318_v17 = vsel %vm1182_vm6, %v1302_v61, %v1071_v30  ;;  %v1518_v25 = vpop.f32.mrf.mxu2 }
 0x1b5   : > { %v1350_v50 = vunpack.c.l.b16 %v1318_v17  ;;  %v1519_v62 = vadd.f32 %v2046_v16, %v1518_v25 }
 0x1b7   : > { %v1537_v41 = vpop.f32.mrf.mxu1  ;;  %v1394_v32 = vpack.c.b16 %v1350_v50, %v1348_v2 }
 0x1b8   : > { %v1538_v37 = vadd.f32 %v1537_v41, %v1509_v38 }
 0x1b9   : > { %1551 = vmatmul.bf16.gmra.mxu3 %v1394_v32 }
 0x1bc   : > { %v1520_v24 = vpop.f32.mrf.mxu2 }
 0x1bd   : > { %v1521_v6 = vadd.f32 %v2046_v16, %v1520_v24 }
 0x1bf   : > { %v1539_v22 = vpop.f32.mrf.mxu1 }
 0x1c0   : > { %v1540_v53 = vadd.f32 %v1539_v22, %v1511_v54 }
 0x1c2   : > { %v1978_v55 = vpack.c.bf16 %v1540_v53, %v1538_v37  ;;  %v1573_v46 = vadd.f32 %v1540_v53, %v1538_v37 }
 0x1c4   : > { %1979 = vst [vmem:[%s2943_s30] sm:$0xff] %v1978_v55  }
 0x1c5   : > { %v1547_v4 = vpop.f32.mrf.mxu3 }
 0x1c6   : > { %v1548_v11 = vadd.f32 %v1547_v4, %v1519_v62 }
 0x1cd   : > { %v1549_v56 = vpop.f32.mrf.mxu3 }
 0x1ce   : > { %v1550_v33 = vadd.f32 %v1549_v56, %v1521_v6 }
 0x1d0   : > { %v1988_v21 = vpack.c.bf16 %v1550_v33, %v1548_v11 }
 0x1d2   : > { %1996 = vst [vmem:[%s2943_s30 + $0x10] sm:$0xff] %v1988_v21  }
 0x1ff   : > { %v1513_v40 = vpop.f32.mrf.mxu0 }
 0x200   : > { %v1514_v27 = vadd.f32 %v2046_v16, %v1513_v40 }
 0x207   : > { %v1515_v35 = vpop.f32.mrf.mxu0 }
 0x208   : > { %v1516_v15 = vadd.f32 %v2046_v16, %v1515_v35 }
 0x225   : > { %v1523_v57 = vpop.f32.mrf.mxu2 }
 0x226   : > { %v1524_v19 = vadd.f32 %v2046_v16, %v1523_v57 }
 0x227   : > { %v1542_v13 = vpop.f32.mrf.mxu1 }
 0x228   : > { %v1543_v58 = vadd.f32 %v1542_v13, %v1514_v27 }
 0x22a   : > { %v1574_v31 = vadd.f32 %v1573_v46, %v1543_v58 }
 0x22d   : > { %v1525_v1 = vpop.f32.mrf.mxu2 }
 0x22e   : > { %v1526_v5 = vadd.f32 %v2046_v16, %v1525_v1 }
 0x22f   : > { %v1544_v23 = vpop.f32.mrf.mxu1 }
 0x230   : > { %v1545_v0 = vadd.f32 %v1544_v23, %v1516_v15 }
 0x232   : > { %v1983_v48 = vpack.c.bf16 %v1545_v0, %v1543_v58  ;;  %v1575_v51 = vadd.f32 %v1574_v31, %v1545_v0 }
 0x234   : > { %1995 = vst [vmem:[%s2943_s30 + $0x8] sm:$0xff] %v1983_v48   ;;  %v1576_v7 = vadd.f32 %v1575_v51, %v1548_v11 }
 0x236   : > { %v1577_v47 = vadd.f32 %v1576_v7, %v1550_v33 }
 0x23c   : > { %v1552_v20 = vpop.f32.mrf.mxu3 }
 0x23d   : > { %v1553_v36 = vadd.f32 %v1552_v20, %v1524_v19 }
 0x23f   : > { %v1578_v9 = vadd.f32 %v1577_v47, %v1553_v36 }
 0x244   : > { %v1554_v43 = vpop.f32.mrf.mxu3 }
 0x245   : > { %v1555_v49 = vadd.f32 %v1554_v43, %v1526_v5 }
 0x247   : > { %v1993_v52 = vpack.c.bf16 %v1555_v49, %v1553_v36  ;;  %v1579_v18 = vadd.f32 %v1578_v9, %v1555_v49 }
 0x249   : > { %1997 = vst [vmem:[%s2943_s30 + $0x18] sm:$0xff] %v1993_v52   ;;  %v1580_v26 = vrot.slane %v1579_v18, 4 }
 0x24b   : > { %v1581_v10 = vadd.f32 %v1580_v26, %v1579_v18 }
 0x24d   : > { %v1582_v60 = vrot.slane %v1581_v10, 2 }
 0x24f   : > { %v1583_v42 = vadd.f32 %v1582_v60, %v1581_v10 }
 0x251   : > { %v1584_v8 = vrot.slane %v1583_v42, 1 }
 0x253   : > { %v1585_v14 = vadd.f32 %v1584_v8, %v1583_v42 }
 0x255   : > { %v1586_v34 = vmul.f32 0.015625, %v1585_v14 }
 0x257   : > { %v1587_v29 = vsub.f32 %v1538_v37, %v1586_v34  ;;  %v1588_v59 = vsub.f32 %v1540_v53, %v1586_v34  ;;  %v1589_v39 = vsub.f32 %v1543_v58, %v1586_v34  ;;  %v1590_v12 = vsub.f32 %v1545_v0, %v1586_v34 }
 0x258   : > { %v1591_v63 = vsub.f32 %v1548_v11, %v1586_v34  ;;  %v1592_v30 = vsub.f32 %v1550_v33, %v1586_v34  ;;  %v1593_v50 = vsub.f32 %v1553_v36, %v1586_v34  ;;  %v1594_v16 = vsub.f32 %v1555_v49, %v1586_v34 }
 0x259   : > { %v1595_v44 = vmul.f32 %v1587_v29, %v1587_v29  ;;  %v1596_v28 = vmul.f32 %v1588_v59, %v1588_v59  ;;  %v1597_v3 = vmul.f32 %v1589_v39, %v1589_v39  ;;  %v1598_v17 = vmul.f32 %v1590_v12, %v1590_v12 }
 0x25a   : > { %v1599_v41 = vmul.f32 %v1591_v63, %v1591_v63  ;;  %v1600_v45 = vmul.f32 %v1592_v30, %v1592_v30  ;;  %v1601_v54 = vmul.f32 %v1593_v50, %v1593_v50  ;;  %v1602_v22 = vmul.f32 %v1594_v16, %v1594_v16 }
 0x25b   : > { %v1603_v61 = vadd.f32 %v1596_v28, %v1595_v44 }
 0x25d   : > { %v1604_v2 = vadd.f32 %v1603_v61, %v1597_v3 }
 0x25f   : > { %v1605_v32 = vadd.f32 %v1604_v2, %v1598_v17 }
 0x261   : > { %v1606_v38 = vadd.f32 %v1605_v32, %v1599_v41 }
 0x263   : > { %v1607_v25 = vadd.f32 %v1606_v38, %v1600_v45 }
 0x265   : > { %v1608_v37 = vadd.f32 %v1607_v25, %v1601_v54 }
 0x267   : > { %v1609_v53 = vadd.f32 %v1608_v37, %v1602_v22 }
 0x269   : > { %v1610_v55 = vrot.slane %v1609_v53, 4 }
 0x26b   : > { %v1611_v4 = vadd.f32 %v1610_v55, %v1609_v53 }
 0x26d   : > { %v1612_v24 = vrot.slane %v1611_v4, 2 }
 0x26f   : > { %v1613_v62 = vadd.f32 %v1612_v24, %v1611_v4 }
 0x271   : > { %v1614_v6 = vrot.slane %v1613_v62, 1 }
 0x273   : > { %v1615_v56 = vadd.f32 %v1614_v6, %v1613_v62 }
 0x275   : > { %v1617_v11 = vsel %vm1616_vm7, %v1585_v14, %v1615_v56 }
 0x276   : > { %1618 = vst [vmem:[%s239_s7] sm:$0x3] %v1617_v11 }
 0x277 PF: > { %s15_s17 = sadd.s32 1, %s2069_s17   ;;  %s2967_s15 = smov %s2065_s16 }
 0x278   : > { %p12_p5 = scmp.ge.s32.totalorder %s15_s17, 4   ;;  %s2968_s16 = smov %s2970_s18 }
 0x27a   :  { %14 = sbr.rel (!%p12_p5) target bundleno = 2 (0x2), region = 78 }

</bundles_post_ra>
